<compile_context>
chip_gen: v6e
topology: v6e:2x2x1
jax: 0.10.0
libtpu: 0.0.40
codegen_flags: <defaults>
</compile_context>

<pallas_src>
import functools

import jax
import jax.numpy as jnp
from jax.experimental import pallas as pl
from jax.experimental.pallas import tpu as pltpu


def _round_up(x, m):
    return ((x + m - 1) // m) * m


# ---------------------------------------------------------------------------
# Pallas kernels
# ---------------------------------------------------------------------------
def _conv_matmul_kernel(x_ref, w_ref, b_ref, o_ref):
    """o = relu(x @ w + b) for one (modality, row-tile) grid step.

    x_ref: [rt, Kp] bf16 (im2col rows)   w_ref: [Kp, Np] bf16 (zero padded)
    b_ref: [1,  Np] f32                  o_ref: [rt, Np] f32 (Np=128 -> lane-dense)
    """
    acc = jnp.dot(x_ref[...], w_ref[...], preferred_element_type=jnp.float32)
    o_ref[...] = jnp.maximum(acc + b_ref[...], 0.0)


def _mlp_kernel(x_ref, w1_ref, b1_ref, w2_ref, b2_ref, o_ref):
    """o = relu(x @ w1 + b1) @ w2 + b2 for one modality grid step (projector)."""
    h = jnp.dot(x_ref[...], w1_ref[...], preferred_element_type=jnp.float32)
    h = jnp.maximum(h + b1_ref[...], 0.0)                      # f32 epilogue (v5e-safe)
    o_ref[...] = jnp.dot(h.astype(w2_ref.dtype), w2_ref[...],
                         preferred_element_type=jnp.float32) + b2_ref[...]


# ---------------------------------------------------------------------------
# Wrappers (layout glue stays in plain JAX)
# ---------------------------------------------------------------------------
def conv3x3_relu_dual(x_nchw, w_stack, b_stack, cout, *, row_tile=512):
    """Fused dual-modality 3x3 stride-1 same-pad conv + ReLU.

    x_nchw:  [2, B, Cin, H, W] f32 (modalities stacked on axis 0)
    w_stack: [2, Kp, Np] bf16, rows in (kh, kw, cin) order, zero padded
    b_stack: [2, 1, Np] f32
    returns  [2, B, cout, H, W] f32 (NCHW per modality).
    """
    Mmod, B, Cin, H, W = x_nchw.shape
    Kp, Np = w_stack.shape[1], w_stack.shape[2]
    Kc = 9 * Cin
    M = B * H * W

    # im2col in bf16 (layout glue; kernel consumes [M, Kp] rows).
    x = jnp.transpose(x_nchw, (0, 1, 3, 4, 2)).astype(jnp.bfloat16)     # NHWC
    xp = jnp.pad(x, ((0, 0), (0, 0), (1, 1), (1, 1), (0, 0)))
    cols = [xp[:, :, kh:kh + H, kw:kw + W, :] for kh in range(3) for kw in range(3)]
    patches = jnp.concatenate(cols, axis=-1).reshape(Mmod, M, Kc)

    rt = _round_up(min(row_tile, M), 16)
    Mp = _round_up(M, rt)
    patches = jnp.pad(patches, ((0, 0), (0, Mp - M), (0, Kp - Kc)))

    flops = 2 * Mmod * Mp * Kp * Np
    bytes_accessed = (patches.size * 2 + w_stack.size * 2 + b_stack.size * 4
                      + Mmod * Mp * Np * 4)

    out = pl.pallas_call(
        _conv_matmul_kernel,
        out_shape=jax.ShapeDtypeStruct((Mmod, Mp, Np), jnp.float32),
        grid_spec=pltpu.PrefetchScalarGridSpec(
            num_scalar_prefetch=0,
            grid=(Mmod, Mp // rt),
            in_specs=[
                pl.BlockSpec((None, rt, Kp), lambda m, i: (m, i, 0)),
                pl.BlockSpec((None, Kp, Np), lambda m, i: (m, 0, 0)),
                pl.BlockSpec((None, 1, Np), lambda m, i: (m, 0, 0)),
            ],
            out_specs=pl.BlockSpec((None, rt, Np), lambda m, i: (m, i, 0)),
        ),
        compiler_params=pltpu.CompilerParams(
            dimension_semantics=("parallel", "parallel"),
            vmem_limit_bytes=32 * 1024 * 1024,
        ),
        cost_estimate=pl.CostEstimate(flops=int(flops), transcendentals=0,
                                      bytes_accessed=int(bytes_accessed)),
    )(patches, w_stack, b_stack)

    out = out[:, :M, :cout].reshape(Mmod, B, H, W, cout)
    return jnp.transpose(out, (0, 1, 4, 2, 3))                  # back to NCHW


def run_projector_dual(flat, w1, b1, w2, b2, embed_dim):
    """Fused dual-modality projector: relu(flat @ w1 + b1) @ w2 + b2.

    flat: [2, B, F] f32; w1: [2, Fp, Ep] bf16; w2: [2, Ep, Ep] bf16; b*: [2, 1, Ep] f32.
    returns [2, B, embed_dim] f32.
    """
    Mmod, B, F = flat.shape
    Fp, Ep = w1.shape[1], w1.shape[2]
    x = flat.astype(jnp.bfloat16)
    if Fp != F:
        x = jnp.pad(x, ((0, 0), (0, 0), (0, Fp - F)))

    flops = 2 * Mmod * B * (Fp * Ep + Ep * Ep)
    bytes_accessed = (x.size * 2 + w1.size * 2 + w2.size * 2
                      + b1.size * 4 + b2.size * 4 + Mmod * B * Ep * 4)

    out = pl.pallas_call(
        _mlp_kernel,
        out_shape=jax.ShapeDtypeStruct((Mmod, B, Ep), jnp.float32),
        grid_spec=pltpu.PrefetchScalarGridSpec(
            num_scalar_prefetch=0,
            grid=(Mmod,),
            in_specs=[
                pl.BlockSpec((None, B, Fp), lambda m: (m, 0, 0)),
                pl.BlockSpec((None, Fp, Ep), lambda m: (m, 0, 0)),
                pl.BlockSpec((None, 1, Ep), lambda m: (m, 0, 0)),
                pl.BlockSpec((None, Ep, Ep), lambda m: (m, 0, 0)),
                pl.BlockSpec((None, 1, Ep), lambda m: (m, 0, 0)),
            ],
            out_specs=pl.BlockSpec((None, B, Ep), lambda m: (m, 0, 0)),
        ),
        compiler_params=pltpu.CompilerParams(
            dimension_semantics=("parallel",),
            vmem_limit_bytes=32 * 1024 * 1024,
        ),
        cost_estimate=pl.CostEstimate(flops=int(flops), transcendentals=0,
                                      bytes_accessed=int(bytes_accessed)),
    )(x, w1, b1, w2, b2)
    return out[:, :, :embed_dim]


# ---------------------------------------------------------------------------
# DualModalityBackbone (JAX/Pallas re-implementation)
# ---------------------------------------------------------------------------
class DualModalityBackbonePallas:
    def __init__(self, key, *, in_ch=3, feat_ch=4, img_size=16, embed_dim=32,
                 outputs=("preflatten_feat", "flatten_feat", "projected_feat"),
                 model_name=""):
        self.name = model_name if model_name else "rgb_synthconv_events_synthconv"
        self.img_size = img_size
        self.outputs = list(outputs)
        self.in_ch = in_ch
        self.feat_ch = feat_ch
        self.embed_dim = embed_dim

        flat_dim = feat_ch * img_size * img_size
        Kc = 9 * in_ch
        self._Kp = _round_up(Kc, 32)                      # MXU-friendly contraction dim
        self._Np = _round_up(max(feat_ch, 128), 128)      # lane-dense conv output
        self._Fp = _round_up(flat_dim, 128)
        self._Ep = _round_up(max(embed_dim, 128), 128)    # lane-dense projector dims

        ks = jax.random.split(key, 12)
        s = 0.05

        def n(k, shp):
            return jax.random.normal(k, shp, jnp.float32) * s

        # raw f32 parameters (also used by the pure-JAX reference in __main__)
        self.raw = {
            "rgb_conv_w": n(ks[0], (Kc, feat_ch)), "rgb_conv_b": n(ks[1], (feat_ch,)),
            "evt_conv_w": n(ks[2], (Kc, feat_ch)), "evt_conv_b": n(ks[3], (feat_ch,)),
            "rgb_w1": n(ks[4], (flat_dim, embed_dim)), "rgb_b1": n(ks[5], (embed_dim,)),
            "rgb_w2": n(ks[6], (embed_dim, embed_dim)), "rgb_b2": n(ks[7], (embed_dim,)),
            "evt_w1": n(ks[8], (flat_dim, embed_dim)), "evt_b1": n(ks[9], (embed_dim,)),
            "evt_w2": n(ks[10], (embed_dim, embed_dim)), "evt_b2": n(ks[11], (embed_dim,)),
        }

        def pad2(a, r, c):
            return jnp.pad(a, ((0, r - a.shape[0]), (0, c - a.shape[1])))

        def pad1(a, c):
            return jnp.pad(a, ((0, c - a.shape[0]),)).reshape(1, c)

        r = self.raw
        # stacked + zero-padded kernel parameters (bf16 matmul operands, f32 biases)
        self.conv_w = jnp.stack([pad2(r["rgb_conv_w"], self._Kp, self._Np),
                                 pad2(r["evt_conv_w"], self._Kp, self._Np)]).astype(jnp.bfloat16)
        self.conv_b = jnp.stack([pad1(r["rgb_conv_b"], self._Np),
                                 pad1(r["evt_conv_b"], self._Np)])
        self.p_w1 = jnp.stack([pad2(r["rgb_w1"], self._Fp, self._Ep),
                               pad2(r["evt_w1"], self._Fp, self._Ep)]).astype(jnp.bfloat16)
        self.p_b1 = jnp.stack([pad1(r["rgb_b1"], self._Ep),
                               pad1(r["evt_b1"], self._Ep)])
        self.p_w2 = jnp.stack([pad2(r["rgb_w2"], self._Ep, self._Ep),
                               pad2(r["evt_w2"], self._Ep, self._Ep)]).astype(jnp.bfloat16)
        self.p_b2 = jnp.stack([pad1(r["rgb_b2"], self._Ep),
                               pad1(r["evt_b2"], self._Ep)])

    @functools.partial(jax.jit, static_argnums=0)
    def forward(self, rgb, events):
        x = jnp.stack([rgb, events], axis=0)                       # [2, B, Cin, H, W]
        feats = conv3x3_relu_dual(x, self.conv_w, self.conv_b, self.feat_ch)
        B = feats.shape[1]
        flat = feats.reshape(2, B, -1)                             # torch flatten(start_dim=1)
        proj = None
        if "projected_feat" in self.outputs:
            proj = run_projector_dual(flat, self.p_w1, self.p_b1,
                                      self.p_w2, self.p_b2, self.embed_dim)
        dicts = []
        for m in range(2):
            d = {}
            if "preflatten_feat" in self.outputs:
                d["preflatten_feat"] = feats[m]
            if "flatten_feat" in self.outputs:
                d["flatten_feat"] = flat[m]
            if proj is not None:
                d["projected_feat"] = proj[m]
            dicts.append(d)
        return dicts[0], dicts[1]

    def get_model_name(self):
        return self.name

    # TODO(synk): get_grad_norm / get_weights_norm are training-time utilities on
    # torch parameter gradients; not part of the forward kernel.


# ---------------------------------------------------------------------------
# Pure-JAX f32 reference (for numerical validation of the bf16 kernels)
# ---------------------------------------------------------------------------
def _reference_forward(model, rgb, events):
    r = model.raw

    def conv_ref(x, w, b):
        B, C, H, W = x.shape
        xt = jnp.transpose(x, (0, 2, 3, 1))
        xp = jnp.pad(xt, ((0, 0), (1, 1), (1, 1), (0, 0)))
        cols = [xp[:, kh:kh + H, kw:kw + W, :] for kh in range(3) for kw in range(3)]
        p = jnp.concatenate(cols, -1).reshape(B * H * W, -1)
        o = jnp.maximum(p @ w + b, 0.0)
        return jnp.transpose(o.reshape(B, H, W, -1), (0, 3, 1, 2))

    def proj_ref(flat, w1, b1, w2, b2):
        return jnp.maximum(flat @ w1 + b1, 0.0) @ w2 + b2

    out = []
    for x, pre in ((rgb, "rgb"), (events, "evt")):
        feat = conv_ref(x, r[pre + "_conv_w"], r[pre + "_conv_b"])
        flat = feat.reshape(feat.shape[0], -1)
        out.append({"preflatten_feat": feat, "flatten_feat": flat,
                    "projected_feat": proj_ref(flat, r[pre + "_w1"], r[pre + "_b1"],
                                               r[pre + "_w2"], r[pre + "_b2"])})
    return out[0], out[1]


# ---------------------------------------------------------------------------
if __name__ == "__main__":
    key = jax.random.PRNGKey(0)
    k_model, k_rgb, k_evt = jax.random.split(key, 3)

    B, C, S, E = 2, 3, 16, 32
    rgb = jax.random.normal(k_rgb, (B, C, S, S), jnp.float32)      # NCHW
    events = jax.random.normal(k_evt, (B, C, S, S), jnp.float32)   # NCHW

    model = DualModalityBackbonePallas(k_model, in_ch=C, feat_ch=4,
                                       img_size=S, embed_dim=E)
    rgb_dict, event_dict = model.forward(rgb, events)
    jax.block_until_ready((rgb_dict, event_dict))

    assert rgb_dict["preflatten_feat"].shape == (B, 4, S, S)
    assert rgb_dict["flatten_feat"].shape == (B, 4 * S * S)
    assert rgb_dict["projected_feat"].shape == (B, E)
    assert event_dict["projected_feat"].shape == (B, E)

    # numerical check vs. pure-JAX f32 reference (bf16 matmul operands -> loose tol)
    ref_rgb, ref_evt = _reference_forward(model, rgb, events)
    for got, ref in ((rgb_dict, ref_rgb), (event_dict, ref_evt)):
        for k in ("preflatten_feat", "flatten_feat", "projected_feat"):
            assert jnp.allclose(got[k], ref[k], atol=5e-2, rtol=5e-2), k

    print("KERNEL_OK")
</pallas_src>

<mosaic_0001>
module attributes {stable_mosaic.version = 11 : i64} {
  func.func @_conv_matmul_kernel(%arg0: i32, %arg1: i32, %arg2: memref<1x512x32xbf16, #tpu.memory_space<vmem>>, %arg3: memref<1x32x128xbf16, #tpu.memory_space<vmem>>, %arg4: memref<1x1x128xf32, #tpu.memory_space<vmem>>, %arg5: memref<1x512x128xf32, #tpu.memory_space<vmem>>) attributes {dimension_semantics = [#tpu.dimension_semantics<parallel>, #tpu.dimension_semantics<parallel>], iteration_bounds = array<i64: 2, 1>, scalar_prefetch = 0 : i64, scratch_operands = 0 : i64, tpu.core_type = #tpu.core_type<tc>, window_params = [{transform_indices = @transform_0, window_bounds = array<i64: 1, 512, 32>}, {transform_indices = @transform_1, window_bounds = array<i64: 1, 32, 128>}, {transform_indices = @transform_2, window_bounds = array<i64: 1, 1, 128>}, {transform_indices = @transform_3, window_bounds = array<i64: 1, 512, 128>}]} {
    %c0 = arith.constant 0 : index
    %c0_0 = arith.constant 0 : index
    %c0_1 = arith.constant 0 : index
    %0 = vector.load %arg2[%c0, %c0_0, %c0_1] : memref<1x512x32xbf16, #tpu.memory_space<vmem>>, vector<1x512x32xbf16>
    %1 = vector.shape_cast %0 : vector<1x512x32xbf16> to vector<512x32xbf16>
    %c0_2 = arith.constant 0 : index
    %c0_3 = arith.constant 0 : index
    %c0_4 = arith.constant 0 : index
    %2 = vector.load %arg3[%c0_2, %c0_3, %c0_4] : memref<1x32x128xbf16, #tpu.memory_space<vmem>>, vector<1x32x128xbf16>
    %3 = vector.shape_cast %2 : vector<1x32x128xbf16> to vector<32x128xbf16>
    %cst = arith.constant dense<0.000000e+00> : vector<512x128xf32>
    %4 = tpu.matmul %1, %3, %cst {dimension_numbers = #tpu.dot_dimension_numbers<[1], [0], [0], [1], [0, 0, 1, 1], [], []>} : vector<512x32xbf16>, vector<32x128xbf16>, vector<512x128xf32> -> vector<512x128xf32>
    %c0_5 = arith.constant 0 : index
    %c0_6 = arith.constant 0 : index
    %c0_7 = arith.constant 0 : index
    %5 = vector.load %arg4[%c0_5, %c0_6, %c0_7] : memref<1x1x128xf32, #tpu.memory_space<vmem>>, vector<1x1x128xf32>
    %6 = vector.shape_cast %5 : vector<1x1x128xf32> to vector<1x128xf32>
    %7 = vector.broadcast %6 : vector<1x128xf32> to vector<512x128xf32>
    %8 = arith.addf %4, %7 : vector<512x128xf32>
    %cst_8 = arith.constant 0.000000e+00 : f32
    %9 = vector.broadcast %cst_8 : f32 to vector<512x128xf32>
    %10 = arith.maximumf %8, %9 : vector<512x128xf32>
    %c0_9 = arith.constant 0 : index
    %c0_10 = arith.constant 0 : index
    %c0_11 = arith.constant 0 : index
    %11 = vector.load %arg5[%c0_9, %c0_10, %c0_11] : memref<1x512x128xf32, #tpu.memory_space<vmem>>, vector<1x512x128xf32>
    %12 = vector.shape_cast %11 : vector<1x512x128xf32> to vector<512x128xf32>
    %13 = vector.shape_cast %10 : vector<512x128xf32> to vector<1x512x128xf32>
    tpu.vector_store %arg5[%c0_9, %c0_10, %c0_11], %13 {strides = array<i32>} : memref<1x512x128xf32, #tpu.memory_space<vmem>>, vector<1x512x128xf32>,
    return
  }
  func.func @transform_0(%arg0: i32, %arg1: i32) -> (i32, i32, i32) {
    %c0_i32 = arith.constant 0 : i32
    %c0_i32_0 = arith.constant 0 : i32
    return %arg0, %arg1, %c0_i32 : i32, i32, i32
  }
  func.func @transform_1(%arg0: i32, %arg1: i32) -> (i32, i32, i32) {
    %c0_i32 = arith.constant 0 : i32
    %c0_i32_0 = arith.constant 0 : i32
    %c0_i32_1 = arith.constant 0 : i32
    return %arg0, %c0_i32, %c0_i32_0 : i32, i32, i32
  }
  func.func @transform_2(%arg0: i32, %arg1: i32) -> (i32, i32, i32) {
    %c0_i32 = arith.constant 0 : i32
    %c0_i32_0 = arith.constant 0 : i32
    %c0_i32_1 = arith.constant 0 : i32
    return %arg0, %c0_i32, %c0_i32_0 : i32, i32, i32
  }
  func.func @transform_3(%arg0: i32, %arg1: i32) -> (i32, i32, i32) {
    %c0_i32 = arith.constant 0 : i32
    %c0_i32_0 = arith.constant 0 : i32
    return %arg0, %arg1, %c0_i32 : i32, i32, i32
  }
}

module attributes {stable_mosaic.version = 11 : i64} {
  func.func @_mlp_kernel(%arg0: i32, %arg1: memref<1x2x1024xbf16, #tpu.memory_space<vmem>>, %arg2: memref<1x1024x128xbf16, #tpu.memory_space<vmem>>, %arg3: memref<1x1x128xf32, #tpu.memory_space<vmem>>, %arg4: memref<1x128x128xbf16, #tpu.memory_space<vmem>>, %arg5: memref<1x1x128xf32, #tpu.memory_space<vmem>>, %arg6: memref<1x2x128xf32, #tpu.memory_space<vmem>>) attributes {dimension_semantics = [#tpu.dimension_semantics<parallel>], iteration_bounds = array<i64: 2>, scalar_prefetch = 0 : i64, scratch_operands = 0 : i64, tpu.core_type = #tpu.core_type<tc>, window_params = [{transform_indices = @transform_0, window_bounds = array<i64: 1, 2, 1024>}, {transform_indices = @transform_1, window_bounds = array<i64: 1, 1024, 128>}, {transform_indices = @transform_2, window_bounds = array<i64: 1, 1, 128>}, {transform_indices = @transform_3, window_bounds = array<i64: 1, 128, 128>}, {transform_indices = @transform_4, window_bounds = array<i64: 1, 1, 128>}, {transform_indices = @transform_5, window_bounds = array<i64: 1, 2, 128>}]} {
    %c0 = arith.constant 0 : index
    %c0_0 = arith.constant 0 : index
    %c0_1 = arith.constant 0 : index
    %0 = vector.load %arg1[%c0, %c0_0, %c0_1] : memref<1x2x1024xbf16, #tpu.memory_space<vmem>>, vector<1x2x1024xbf16>
    %1 = vector.shape_cast %0 : vector<1x2x1024xbf16> to vector<2x1024xbf16>
    %c0_2 = arith.constant 0 : index
    %c0_3 = arith.constant 0 : index
    %c0_4 = arith.constant 0 : index
    %2 = vector.load %arg2[%c0_2, %c0_3, %c0_4] : memref<1x1024x128xbf16, #tpu.memory_space<vmem>>, vector<1x1024x128xbf16>
    %3 = vector.shape_cast %2 : vector<1x1024x128xbf16> to vector<1024x128xbf16>
    %cst = arith.constant dense<0.000000e+00> : vector<2x128xf32>
    %4 = tpu.matmul %1, %3, %cst {dimension_numbers = #tpu.dot_dimension_numbers<[1], [0], [0], [1], [0, 0, 1, 1], [], []>} : vector<2x1024xbf16>, vector<1024x128xbf16>, vector<2x128xf32> -> vector<2x128xf32>
    %c0_5 = arith.constant 0 : index
    %c0_6 = arith.constant 0 : index
    %c0_7 = arith.constant 0 : index
    %5 = vector.load %arg3[%c0_5, %c0_6, %c0_7] : memref<1x1x128xf32, #tpu.memory_space<vmem>>, vector<1x1x128xf32>
    %6 = vector.shape_cast %5 : vector<1x1x128xf32> to vector<1x128xf32>
    %7 = vector.broadcast %6 : vector<1x128xf32> to vector<2x128xf32>
    %8 = arith.addf %4, %7 : vector<2x128xf32>
    %cst_8 = arith.constant 0.000000e+00 : f32
    %9 = vector.broadcast %cst_8 : f32 to vector<2x128xf32>
    %10 = arith.maximumf %8, %9 : vector<2x128xf32>
    %11 = arith.truncf %10 : vector<2x128xf32> to vector<2x128xbf16>
    %c0_9 = arith.constant 0 : index
    %c0_10 = arith.constant 0 : index
    %c0_11 = arith.constant 0 : index
    %12 = vector.load %arg4[%c0_9, %c0_10, %c0_11] : memref<1x128x128xbf16, #tpu.memory_space<vmem>>, vector<1x128x128xbf16>
    %13 = vector.shape_cast %12 : vector<1x128x128xbf16> to vector<128x128xbf16>
    %cst_12 = arith.constant dense<0.000000e+00> : vector<2x128xf32>
    %14 = tpu.matmul %11, %13, %cst_12 {dimension_numbers = #tpu.dot_dimension_numbers<[1], [0], [0], [1], [0, 0, 1, 1], [], []>} : vector<2x128xbf16>, vector<128x128xbf16>, vector<2x128xf32> -> vector<2x128xf32>
    %c0_13 = arith.constant 0 : index
    %c0_14 = arith.constant 0 : index
    %c0_15 = arith.constant 0 : index
    %15 = vector.load %arg5[%c0_13, %c0_14, %c0_15] : memref<1x1x128xf32, #tpu.memory_space<vmem>>, vector<1x1x128xf32>
    %16 = vector.shape_cast %15 : vector<1x1x128xf32> to vector<1x128xf32>
    %17 = vector.broadcast %16 : vector<1x128xf32> to vector<2x128xf32>
    %18 = arith.addf %14, %17 : vector<2x128xf32>
    %c0_16 = arith.constant 0 : index
    %c0_17 = arith.constant 0 : index
    %c0_18 = arith.constant 0 : index
    %19 = vector.load %arg6[%c0_16, %c0_17, %c0_18] : memref<1x2x128xf32, #tpu.memory_space<vmem>>, vector<1x2x128xf32>
    %20 = vector.shape_cast %19 : vector<1x2x128xf32> to vector<2x128xf32>
    %21 = vector.shape_cast %18 : vector<2x128xf32> to vector<1x2x128xf32>
    tpu.vector_store %arg6[%c0_16, %c0_17, %c0_18], %21 {strides = array<i32>} : memref<1x2x128xf32, #tpu.memory_space<vmem>>, vector<1x2x128xf32>,
    return
  }
  func.func @transform_0(%arg0: i32) -> (i32, i32, i32) {
    %c0_i32 = arith.constant 0 : i32
    %c0_i32_0 = arith.constant 0 : i32
    %c0_i32_1 = arith.constant 0 : i32
    return %arg0, %c0_i32, %c0_i32_0 : i32, i32, i32
  }
  func.func @transform_1(%arg0: i32) -> (i32, i32, i32) {
    %c0_i32 = arith.constant 0 : i32
    %c0_i32_0 = arith.constant 0 : i32
    %c0_i32_1 = arith.constant 0 : i32
    return %arg0, %c0_i32, %c0_i32_0 : i32, i32, i32
  }
  func.func @transform_2(%arg0: i32) -> (i32, i32, i32) {
    %c0_i32 = arith.constant 0 : i32
    %c0_i32_0 = arith.constant 0 : i32
    %c0_i32_1 = arith.constant 0 : i32
    return %arg0, %c0_i32, %c0_i32_0 : i32, i32, i32
  }
  func.func @transform_3(%arg0: i32) -> (i32, i32, i32) {
    %c0_i32 = arith.constant 0 : i32
    %c0_i32_0 = arith.constant 0 : i32
    %c0_i32_1 = arith.constant 0 : i32
    return %arg0, %c0_i32, %c0_i32_0 : i32, i32, i32
  }
  func.func @transform_4(%arg0: i32) -> (i32, i32, i32) {
    %c0_i32 = arith.constant 0 : i32
    %c0_i32_0 = arith.constant 0 : i32
    %c0_i32_1 = arith.constant 0 : i32
    return %arg0, %c0_i32, %c0_i32_0 : i32, i32, i32
  }
  func.func @transform_5(%arg0: i32) -> (i32, i32, i32) {
    %c0_i32 = arith.constant 0 : i32
    %c0_i32_0 = arith.constant 0 : i32
    %c0_i32_1 = arith.constant 0 : i32
    return %arg0, %c0_i32, %c0_i32_0 : i32, i32, i32
  }
}

</mosaic_0001>

<bundles_post_ra>
// kernel: squeeze.7
= control target key start
LH: loop header
LB: loop body
LE: loop exit
PB: predicated region body
PF: predicated region fallthrough
CT: control target
= control target key end

     0   :  { %vm26_vm0 = vcmask 1042433   ;;  %vm31_vm1 = vcmask 1044483   ;;  %vm36_vm2 = vcmask 1046533   ;;  %vm40_vm3 = vcmask 1047559   ;;  %s87_s8 = smov 6  ;;  %s92_s9 = smov 24  ;;  %s965_s0 = inlined_call_operand.vmem [shape: f32[1,2,4,16,16], index: 0, kind: input, shape index: {}]   ;;  %s966_s1 = inlined_call_operand.hbm [shape: f32[2,1024], index: 1, kind: output, shape index: {}]  }
   0x1   :  { %v546_v0 = vld [vmem:[%s965_s0 + $0x6] sm:$0x1]   ;;  %v550_v1 = vld [vmem:[%s965_s0 + $0x57] sm:$0x80]   ;;  %v536_v2 = vld [vmem:[%s965_s0 + $0x7] sm:$0x1]  }
   0x2   :  { %v547_v3 = vld [vmem:[%s965_s0 + $0x7e] ss:$-56 sm:%s87_s8]   ;;  %s97_s18 = smov 96  ;;  %s24_s21 = smov 6  ;;  %v540_v7 = vld [vmem:[%s965_s0 + $0x58] sm:$0x80]  }
   0x3   :  { %v548_v4 = vld [vmem:[%s965_s0 + $0xf6] ss:$-56 sm:%s92_s9]   ;;  %v90_v5 = vsel %vm26_vm0, %v547_v3, %v546_v0  ;;  %s29_s22 = smov 24  ;;  %v537_v9 = vld [vmem:[%s965_s0 + $0x7f] ss:$-56 sm:%s24_s21]   ;;  %s34_s29 = smov 96 }
   0x4   :  { %v549_v6 = vld [vmem:[%s965_s0 + $0x16e] ss:$-56 sm:%s97_s18]   ;;  %v95_v8 = vsel %vm31_vm1, %v548_v4, %v90_v5  ;;  %v538_v10 = vld [vmem:[%s965_s0 + $0xf7] ss:$-56 sm:%s29_s22]   ;;  %v27_v12 = vsel %vm26_vm0, %v537_v9, %v536_v2  ;;  %s118_s5 = smov 6  ;;  %s123_s6 = smov 24 }
   0x5   :  { %v100_v11 = vsel %vm36_vm2, %v549_v6, %v95_v8  ;;  %v539_v13 = vld [vmem:[%s965_s0 + $0x16f] ss:$-56 sm:%s34_s29]   ;;  %v551_v14 = vld [vmem:[%s965_s0 + $0x26] sm:$0x1]   ;;  %v32_v16 = vsel %vm31_vm1, %v538_v10, %v27_v12  ;;  %s128_s11 = smov 96  ;;  %s55_s12 = smov 6 }
   0x6   :  { %v104_v15 = vsel %vm40_vm3, %v550_v1, %v100_v11  ;;  %v552_v17 = vld [vmem:[%s965_s0 + $0x9e] ss:$-56 sm:%s118_s5]   ;;  %s636_s13 = smov 96   ;;  %v37_v19 = vsel %vm36_vm2, %v539_v13, %v32_v16  ;;  %s60_s18 = smov 24  ;;  %v541_v25 = vld [vmem:[%s965_s0 + $0x27] sm:$0x1]  }
   0x7   :  { %v553_v18 = vld [vmem:[%s965_s0 + $0x116] ss:$-56 sm:%s123_s6]   ;;  %105 = vrot.lane.b32.xlu1 %v104_v15, %s636_s13  ;;  %v121_v20 = vsel %vm26_vm0, %v552_v17, %v551_v14  ;;  %s65_s19 = smov 96  ;;  %v41_v23 = vsel %vm40_vm3, %v540_v7, %v37_v19  ;;  %v545_v27 = vld [vmem:[%s965_s0 + $0x78] sm:$0x80]   ;;  %s637_s26 = smov 112  }
   0x8   :  { %v554_v21 = vld [vmem:[%s965_s0 + $0x18e] ss:$-56 sm:%s128_s11]   ;;  %v126_v24 = vsel %vm31_vm1, %v553_v18, %v121_v20  ;;  %v542_v26 = vld [vmem:[%s965_s0 + $0x9f] ss:$-56 sm:%s55_s12]   ;;  %s181_s2 = smov 6  ;;  %s186_s7 = smov 24 }
   0x9   :  { %v555_v22 = vld [vmem:[%s965_s0 + $0x77] sm:$0x80]   ;;  %42 = vrot.lane.b32.xlu0 %v41_v23, %s637_s26  ;;  %v131_v28 = vsel %vm36_vm2, %v554_v21, %v126_v24  ;;  %v58_v29 = vsel %vm26_vm0, %v542_v26, %v541_v25  ;;  %v543_v30 = vld [vmem:[%s965_s0 + $0x117] ss:$-56 sm:%s60_s18]   ;;  %s191_s8 = smov 96  ;;  %s155_s14 = smov 24 }
   0xa   :  { %v561_v31 = vld [vmem:[%s965_s0 + $0x25] sm:$0x1]   ;;  %v135_v32 = vsel %vm40_vm3, %v555_v22, %v131_v28  ;;  %v63_v33 = vsel %vm31_vm1, %v543_v30, %v58_v29  ;;  %v544_v34 = vld [vmem:[%s965_s0 + $0x18f] ss:$-56 sm:%s65_s19]   ;;  %v565_v39 = vld [vmem:[%s965_s0 + $0x76] sm:$0x80]  }
   0xb   :  { %v562_v35 = vld [vmem:[%s965_s0 + $0x9d] ss:$-56 sm:%s181_s2]   ;;  %136 = vrot.lane.b32.xlu1 %v135_v32, %s636_s13  ;;  %v68_v36 = vsel %vm36_vm2, %v544_v34, %v63_v33  ;;  %s150_s13 = smov 6  ;;  %s160_s19 = smov 96  ;;  %v571_v52 = vld [vmem:[%s965_s0 + $0x24] sm:$0x1]  }
   0xc   :  { %v184_v37 = vsel %vm26_vm0, %v562_v35, %v561_v31  ;;  %v563_v38 = vld [vmem:[%s965_s0 + $0x115] ss:$-56 sm:%s186_s7]   ;;  %v72_v40 = vsel %vm40_vm3, %v545_v27, %v68_v36  ;;  %s244_s24 = smov 6  ;;  %s249_s25 = smov 24  ;;  %v575_v60 = vld [vmem:[%s965_s0 + $0x75] sm:$0x80]  }
   0xd   :  { %v189_v41 = vsel %vm31_vm1, %v563_v38, %v184_v37  ;;  %v564_v42 = vld [vmem:[%s965_s0 + $0x18d] ss:$-56 sm:%s191_s8]   ;;  %73 = vrot.lane.b32.xlu0 %v72_v40, %s637_s26  ;;  %s254_s30 = smov 96  ;;  %s213_s2 = smov 6  ;;  %v566_v61 = vld [vmem:[%s965_s0 + $0x4] sm:$0x1]  }
   0xe   :  { %v556_v43 = vld [vmem:[%s965_s0 + $0x5] sm:$0x1]   ;;  %v194_v44 = vsel %vm36_vm2, %v564_v42, %v189_v41  ;;  %v560_v46 = vld [vmem:[%s965_s0 + $0x56] sm:$0x80]   ;;  %s638_s3 = smov 80   ;;  %s218_s8 = smov 24 }
   0xf   :  { %v557_v45 = vld [vmem:[%s965_s0 + $0x7d] ss:$-56 sm:%s150_s13]   ;;  %v198_v47 = vsel %vm40_vm3, %v565_v39, %v194_v44  ;;  %v572_v53 = vld [vmem:[%s965_s0 + $0x9c] ss:$-56 sm:%s244_s24]   ;;  %s223_s13 = smov 96  ;;  %s317_s26 = smov 96 }
  0x10   :  { %v153_v48 = vsel %vm26_vm0, %v557_v45, %v556_v43  ;;  %v558_v49 = vld [vmem:[%s965_s0 + $0xf5] ss:$-56 sm:%s155_s14]   ;;  %199 = vrot.lane.b32.xlu1 %v198_v47, %s638_s3  ;;  %v247_v55 = vsel %vm26_vm0, %v572_v53, %v571_v52  ;;  %s307_s14 = smov 6  ;;  %v570_v2 = vld [vmem:[%s965_s0 + $0x55] sm:$0x80]   ;;  %s639_s4 = smov 64  }
  0x11   :  { %v559_v50 = vld [vmem:[%s965_s0 + $0x16d] ss:$-56 sm:%s160_s19]   ;;  %v158_v51 = vsel %vm31_vm1, %v558_v49, %v153_v48  ;;  %v573_v56 = vld [vmem:[%s965_s0 + $0x114] ss:$-56 sm:%s249_s25]   ;;  %s312_s25 = smov 24  ;;  %s276_s9 = smov 6 }
  0x12   :  { %v163_v54 = vsel %vm36_vm2, %v559_v50, %v158_v51  ;;  %v574_v57 = vld [vmem:[%s965_s0 + $0x18c] ss:$-56 sm:%s254_s30]   ;;  %v252_v59 = vsel %vm31_vm1, %v573_v56, %v247_v55  ;;  %v581_v6 = vld [vmem:[%s965_s0 + $0x23] sm:$0x1]   ;;  %v585_v7 = vld [vmem:[%s965_s0 + $0x74] sm:$0x80]  }
  0x13   :  { %v167_v58 = vsel %vm40_vm3, %v560_v46, %v163_v54  ;;  %v567_v62 = vld [vmem:[%s965_s0 + $0x7c] ss:$-56 sm:%s213_s2]   ;;  %v257_v63 = vsel %vm36_vm2, %v574_v57, %v252_v59  ;;  %v582_v9 = vld [vmem:[%s965_s0 + $0x9b] ss:$-56 sm:%s307_s14]   ;;  %s281_s10 = smov 24  ;;  %s286_s15 = smov 96 }
  0x14   :  { %168 = vrot.lane.b32.xlu0 %v167_v58, %s638_s3  ;;  %v216_v0 = vsel %vm26_vm0, %v567_v62, %v566_v61  ;;  %v568_v1 = vld [vmem:[%s965_s0 + $0xf4] ss:$-56 sm:%s218_s8]   ;;  %v261_v3 = vsel %vm40_vm3, %v575_v60, %v257_v63  ;;  %v576_v10 = vld [vmem:[%s965_s0 + $0x3] sm:$0x1]   ;;  %v310_v12 = vsel %vm26_vm0, %v582_v9, %v581_v6  ;;  %s370_s20 = smov 6  ;;  %s375_s21 = smov 24 }
  0x15   :  { %v221_v4 = vsel %vm31_vm1, %v568_v1, %v216_v0  ;;  %v569_v5 = vld [vmem:[%s965_s0 + $0x16c] ss:$-56 sm:%s223_s13]   ;;  %262 = vrot.lane.b32.xlu1 %v261_v3, %s639_s4  ;;  %v580_v17 = vld [vmem:[%s965_s0 + $0x54] sm:$0x80]   ;;  %s339_s27 = smov 6  ;;  %s640_s5 = smov 48  }
  0x16   :  { %v226_v8 = vsel %vm36_vm2, %v569_v5, %v221_v4  ;;  %v583_v13 = vld [vmem:[%s965_s0 + $0x113] ss:$-56 sm:%s312_s25]   ;;  %v591_v24 = vld [vmem:[%s965_s0 + $0x22] sm:$0x1]   ;;  %v595_v26 = vld [vmem:[%s965_s0 + $0x73] sm:$0x80]  }
  0x17   :  { %v230_v11 = vsel %vm40_vm3, %v570_v2, %v226_v8  ;;  %v584_v14 = vld [vmem:[%s965_s0 + $0x18b] ss:$-56 sm:%s317_s26]   ;;  %v315_v15 = vsel %vm31_vm1, %v583_v13, %v310_v12  ;;  %s380_s26 = smov 96  ;;  %v592_v25 = vld [vmem:[%s965_s0 + $0x9a] ss:$-56 sm:%s370_s20]   ;;  %s349_s11 = smov 96 }
  0x18   :  { %231 = vrot.lane.b32.xlu0 %v230_v11, %s639_s4  ;;  %v577_v16 = vld [vmem:[%s965_s0 + $0x7b] ss:$-56 sm:%s276_s9]   ;;  %v320_v18 = vsel %vm36_vm2, %v584_v14, %v315_v15  ;;  %v373_v28 = vsel %vm26_vm0, %v592_v25, %v591_v24  ;;  %v586_v30 = vld [vmem:[%s965_s0 + $0x2] sm:$0x1]   ;;  %s433_s16 = smov 6  ;;  %s443_s22 = smov 96 }
  0x19   :  { %v279_v19 = vsel %vm26_vm0, %v577_v16, %v576_v10  ;;  %v578_v20 = vld [vmem:[%s965_s0 + $0xf3] ss:$-56 sm:%s281_s10]   ;;  %v324_v22 = vsel %vm40_vm3, %v585_v7, %v320_v18  ;;  %v593_v29 = vld [vmem:[%s965_s0 + $0x112] ss:$-56 sm:%s375_s21]   ;;  %s344_s10 = smov 24  ;;  %s438_s21 = smov 24 }
  0x1a   :  { %v579_v21 = vld [vmem:[%s965_s0 + $0x16b] ss:$-56 sm:%s286_s15]   ;;  %v284_v23 = vsel %vm31_vm1, %v578_v20, %v279_v19  ;;  %325 = vrot.lane.b32.xlu1 %v324_v22, %s640_s5  ;;  %v378_v32 = vsel %vm31_vm1, %v593_v29, %v373_v28  ;;  %v590_v38 = vld [vmem:[%s965_s0 + $0x53] sm:$0x80]   ;;  %s641_s29 = smov 32   ;;  %s407_s6 = smov 24 }
  0x1b   :  { %v289_v27 = vsel %vm36_vm2, %v579_v21, %v284_v23  ;;  %v594_v33 = vld [vmem:[%s965_s0 + $0x18a] ss:$-56 sm:%s380_s26]   ;;  %v601_v42 = vld [vmem:[%s965_s0 + $0x21] sm:$0x1]   ;;  %v605_v43 = vld [vmem:[%s965_s0 + $0x72] sm:$0x80]  }
  0x1c   :  { %v293_v31 = vsel %vm40_vm3, %v580_v17, %v289_v27  ;;  %v587_v34 = vld [vmem:[%s965_s0 + $0x7a] ss:$-56 sm:%s339_s27]   ;;  %v383_v35 = vsel %vm36_vm2, %v594_v33, %v378_v32  ;;  %v602_v45 = vld [vmem:[%s965_s0 + $0x99] ss:$-56 sm:%s433_s16]   ;;  %vm5_vm4 = vcmask 1047556   ;;  %vm7_vm5 = vcmask 130048  }
  0x1d   :  { %294 = vrot.lane.b32.xlu0 %v293_v31, %s640_s5  ;;  %v342_v36 = vsel %vm26_vm0, %v587_v34, %v586_v30  ;;  %v588_v37 = vld [vmem:[%s965_s0 + $0xf2] ss:$-56 sm:%s344_s10]   ;;  %v387_v39 = vsel %vm40_vm3, %v595_v26, %v383_v35  ;;  %v596_v46 = vld [vmem:[%s965_s0 + $0x1] sm:$0x1]   ;;  %s402_s5 = smov 6  ;;  %v436_v48 = vsel %vm26_vm0, %v602_v45, %v601_v42  ;;  %s642_s24 = smov 16  }
  0x1e   :  { %v347_v40 = vsel %vm31_vm1, %v588_v37, %v342_v36  ;;  %v589_v41 = vld [vmem:[%s965_s0 + $0x16a] ss:$-56 sm:%s349_s11]   ;;  %388 = vrot.lane.b32.xlu1 %v387_v39, %s641_s29  ;;  %s412_s11 = smov 96  ;;  %v600_v53 = vld [vmem:[%s965_s0 + $0x52] sm:$0x80]  }
  0x1f   :  { %v352_v44 = vsel %vm36_vm2, %v589_v41, %v347_v40  ;;  %v603_v49 = vld [vmem:[%s965_s0 + $0x111] ss:$-56 sm:%s438_s21]   ;;  %v3_v60 = vld [vmem:[%s965_s0] ss:$8 sm:$0xf]  }
  0x20   :  { %v356_v47 = vsel %vm40_vm3, %v590_v38, %v352_v44  ;;  %v604_v50 = vld [vmem:[%s965_s0 + $0x189] ss:$-56 sm:%s443_s22]   ;;  %v441_v51 = vsel %vm31_vm1, %v603_v49, %v436_v48  ;;  %v4_v61 = vld [vmem:[%s965_s0] ss:$8 sm:$0xf0]  }
  0x21   :  { %357 = vrot.lane.b32.xlu0 %v356_v47, %s641_s29  ;;  %v597_v52 = vld [vmem:[%s965_s0 + $0x79] ss:$-56 sm:%s402_s5]   ;;  %v446_v54 = vsel %vm36_vm2, %v604_v50, %v441_v51  ;;  %v6_v63 = vsel %vm5_vm4, %v4_v61, %v3_v60  ;;  %v534_v0 = vld [vmem:[%s965_s0 + $0x40] ss:$8 sm:$0xf]  }
  0x22   :  { %v405_v55 = vsel %vm26_vm0, %v597_v52, %v596_v46  ;;  %v598_v56 = vld [vmem:[%s965_s0 + $0xf1] ss:$-56 sm:%s407_s6]   ;;  %v450_v58 = vsel %vm40_vm3, %v605_v43, %v446_v54  ;;  %v535_v1 = vld [vmem:[%s965_s0 + $0x40] ss:$8 sm:$0xf0]  }
  0x23   :  { %v599_v57 = vld [vmem:[%s965_s0 + $0x169] ss:$-56 sm:%s412_s11]   ;;  %v410_v59 = vsel %vm31_vm1, %v598_v56, %v405_v55  ;;  %451 = vrot.lane.b32.xlu1 %v450_v58, %s642_s24  ;;  %8 = vst.msk [vmem:[#allocation2] ss:$8 sm:$0xf] %vm7_vm5, %v6_v63   ;;  %v15_v3 = vsel %vm5_vm4, %v535_v1, %v534_v0 }
  0x24   :  { %v415_v62 = vsel %vm36_vm2, %v599_v57, %v410_v59  ;;  %9 = vst.msk [vmem:[#allocation2] ss:$8 sm:$0xf0] %vm7_vm5, %v6_v63  }
  0x25   :  { %v419_v2 = vsel %vm40_vm3, %v600_v53, %v415_v62 }
  0x26   :  { %2 = vsyncpa [#allocation1], 0  ;;  %420 = vrot.lane.b32.xlu0 %v419_v2, %s642_s24  ;;  %18 = vst.msk [vmem:[#allocation2 + $0x1] ss:$8 sm:$0xf] %vm7_vm5, %v15_v3   ;;  %vm44_vm6 = vcmask 1048448  }
  0x27   :  { %20 = vst.msk [vmem:[#allocation2 + $0x1] ss:$8 sm:$0xf0] %vm7_vm5, %v15_v3   ;;  %vm107_vm7 = vcmask 917248   ;;  %vm170_vm8 = vcmask 786048   ;;  %vm233_vm9 = vcmask 654848  }
  0x28   :  { %vm296_vm10 = vcmask 523648   ;;  %vm359_vm11 = vcmask 392448   ;;  %vm422_vm12 = vcmask 261248   ;;  %s643_s0 = smov [#allocation0]  }
  0x29   :  { %s522_s29 = sshll.u32 %s643_s0, 4  ;;  %s523_s29 = int_to_ptr.vmem [resolvable:$true] %s522_s29 }
  0x2a   :  { %s614_s30 = scalar_lea.vmem %s523_s29, 256  ;;  %p619_p1 = scmp.lt.s32.totalorder %s523_s29, %s523_s29 }
  0x2b   :  { %p615_p0 = scmp.ne.s32.totalorder %s523_s29, %s614_s30  ;;  %p620_p2 = scmp.lt.s32.totalorder %s614_s30, %s614_s30 }
  0x2d   :  { %p621_p3 = por %p620_p2, %p619_p1 }
  0x2f   :  { %p622_p4 = pnand %p621_p3, %p615_p0 }
  0x79   :  { %v106_v4 = vpop.permute.xlu1 %105  }
  0x7b   :  { %v43_v5 = vpop.permute.xlu0 %42  }
  0x7c   :  { %45 = vst.msk [vmem:[#allocation2] sm:$0x3] %vm44_vm6, %v43_v5   ;;  %47 = vst.msk [vmem:[#allocation2 + $0x6] sm:$0xc] %vm44_vm6, %v43_v5  }
  0x7d   :  { %49 = vst.msk [vmem:[#allocation2 + $0xc] sm:$0x30] %vm44_vm6, %v43_v5   ;;  %51 = vst.msk [vmem:[#allocation2 + $0x12] sm:$0xc0] %vm44_vm6, %v43_v5   ;;  %v137_v6 = vpop.permute.xlu1 %136  }
  0x7e   :  { %108 = vst.msk [vmem:[#allocation2] sm:$0x3] %vm107_vm7, %v106_v4   ;;  %110 = vst.msk [vmem:[#allocation2 + $0x6] sm:$0xc] %vm107_vm7, %v106_v4  }
  0x7f   :  { %112 = vst.msk [vmem:[#allocation2 + $0xc] sm:$0x30] %vm107_vm7, %v106_v4   ;;  %114 = vst.msk [vmem:[#allocation2 + $0x12] sm:$0xc0] %vm107_vm7, %v106_v4   ;;  %v74_v7 = vpop.permute.xlu0 %73  }
  0x80   :  { %77 = vst.msk [vmem:[#allocation2 + $0x20] sm:$0x3] %vm44_vm6, %v74_v7   ;;  %79 = vst.msk [vmem:[#allocation2 + $0x26] sm:$0xc] %vm44_vm6, %v74_v7  }
  0x81   :  { %81 = vst.msk [vmem:[#allocation2 + $0x2c] sm:$0x30] %vm44_vm6, %v74_v7   ;;  %83 = vst.msk [vmem:[#allocation2 + $0x32] sm:$0xc0] %vm44_vm6, %v74_v7  }
  0x82   :  { %140 = vst.msk [vmem:[#allocation2 + $0x20] sm:$0x3] %vm107_vm7, %v137_v6   ;;  %142 = vst.msk [vmem:[#allocation2 + $0x26] sm:$0xc] %vm107_vm7, %v137_v6   ;;  %v200_v8 = vpop.permute.xlu1 %199  }
  0x83   :  { %144 = vst.msk [vmem:[#allocation2 + $0x2c] sm:$0x30] %vm107_vm7, %v137_v6   ;;  %146 = vst.msk [vmem:[#allocation2 + $0x32] sm:$0xc0] %vm107_vm7, %v137_v6  }
  0x84   :  { %203 = vst.msk [vmem:[#allocation2 + $0x20] sm:$0x3] %vm170_vm8, %v200_v8   ;;  %205 = vst.msk [vmem:[#allocation2 + $0x26] sm:$0xc] %vm170_vm8, %v200_v8  }
  0x85   :  { %207 = vst.msk [vmem:[#allocation2 + $0x2c] sm:$0x30] %vm170_vm8, %v200_v8   ;;  %209 = vst.msk [vmem:[#allocation2 + $0x32] sm:$0xc0] %vm170_vm8, %v200_v8  }
  0x86   :  { %v169_v9 = vpop.permute.xlu0 %168  }
  0x87   :  { %171 = vst.msk [vmem:[#allocation2] sm:$0x3] %vm170_vm8, %v169_v9   ;;  %173 = vst.msk [vmem:[#allocation2 + $0x6] sm:$0xc] %vm170_vm8, %v169_v9   ;;  %v263_v10 = vpop.permute.xlu1 %262  }
  0x88   :  { %175 = vst.msk [vmem:[#allocation2 + $0xc] sm:$0x30] %vm170_vm8, %v169_v9   ;;  %177 = vst.msk [vmem:[#allocation2 + $0x12] sm:$0xc0] %vm170_vm8, %v169_v9  }
  0x89   :  { %266 = vst.msk [vmem:[#allocation2 + $0x20] sm:$0x3] %vm233_vm9, %v263_v10   ;;  %268 = vst.msk [vmem:[#allocation2 + $0x26] sm:$0xc] %vm233_vm9, %v263_v10  }
  0x8a   :  { %270 = vst.msk [vmem:[#allocation2 + $0x2c] sm:$0x30] %vm233_vm9, %v263_v10   ;;  %272 = vst.msk [vmem:[#allocation2 + $0x32] sm:$0xc0] %vm233_vm9, %v263_v10   ;;  %v232_v11 = vpop.permute.xlu0 %231  }
  0x8b   :  { %234 = vst.msk [vmem:[#allocation2] sm:$0x3] %vm233_vm9, %v232_v11   ;;  %236 = vst.msk [vmem:[#allocation2 + $0x6] sm:$0xc] %vm233_vm9, %v232_v11  }
  0x8c   :  { %238 = vst.msk [vmem:[#allocation2 + $0xc] sm:$0x30] %vm233_vm9, %v232_v11   ;;  %240 = vst.msk [vmem:[#allocation2 + $0x12] sm:$0xc0] %vm233_vm9, %v232_v11   ;;  %v326_v12 = vpop.permute.xlu1 %325  }
  0x8d   :  { %329 = vst.msk [vmem:[#allocation2 + $0x20] sm:$0x3] %vm296_vm10, %v326_v12   ;;  %331 = vst.msk [vmem:[#allocation2 + $0x26] sm:$0xc] %vm296_vm10, %v326_v12  }
  0x8e   :  { %333 = vst.msk [vmem:[#allocation2 + $0x2c] sm:$0x30] %vm296_vm10, %v326_v12   ;;  %335 = vst.msk [vmem:[#allocation2 + $0x32] sm:$0xc0] %vm296_vm10, %v326_v12  }
  0x8f   :  { %v295_v13 = vpop.permute.xlu0 %294  }
  0x90   :  { %297 = vst.msk [vmem:[#allocation2] sm:$0x3] %vm296_vm10, %v295_v13   ;;  %299 = vst.msk [vmem:[#allocation2 + $0x6] sm:$0xc] %vm296_vm10, %v295_v13   ;;  %v389_v14 = vpop.permute.xlu1 %388  }
  0x91   :  { %301 = vst.msk [vmem:[#allocation2 + $0xc] sm:$0x30] %vm296_vm10, %v295_v13   ;;  %303 = vst.msk [vmem:[#allocation2 + $0x12] sm:$0xc0] %vm296_vm10, %v295_v13  }
  0x92   :  { %392 = vst.msk [vmem:[#allocation2 + $0x20] sm:$0x3] %vm359_vm11, %v389_v14   ;;  %394 = vst.msk [vmem:[#allocation2 + $0x26] sm:$0xc] %vm359_vm11, %v389_v14  }
  0x93   :  { %396 = vst.msk [vmem:[#allocation2 + $0x2c] sm:$0x30] %vm359_vm11, %v389_v14   ;;  %398 = vst.msk [vmem:[#allocation2 + $0x32] sm:$0xc0] %vm359_vm11, %v389_v14   ;;  %v358_v15 = vpop.permute.xlu0 %357  }
  0x94   :  { %360 = vst.msk [vmem:[#allocation2] sm:$0x3] %vm359_vm11, %v358_v15   ;;  %362 = vst.msk [vmem:[#allocation2 + $0x6] sm:$0xc] %vm359_vm11, %v358_v15  }
  0x95   :  { %364 = vst.msk [vmem:[#allocation2 + $0xc] sm:$0x30] %vm359_vm11, %v358_v15   ;;  %366 = vst.msk [vmem:[#allocation2 + $0x12] sm:$0xc0] %vm359_vm11, %v358_v15   ;;  %v452_v16 = vpop.permute.xlu1 %451  }
  0x96   :  { %455 = vst.msk [vmem:[#allocation2 + $0x20] sm:$0x3] %vm422_vm12, %v452_v16   ;;  %457 = vst.msk [vmem:[#allocation2 + $0x26] sm:$0xc] %vm422_vm12, %v452_v16  }
  0x97   :  { %459 = vst.msk [vmem:[#allocation2 + $0x2c] sm:$0x30] %vm422_vm12, %v452_v16   ;;  %461 = vst.msk [vmem:[#allocation2 + $0x32] sm:$0xc0] %vm422_vm12, %v452_v16  }
  0x98   :  { %v421_v17 = vpop.permute.xlu0 %420  }
  0x99   :  { %423 = vst.msk [vmem:[#allocation2] sm:$0x3] %vm422_vm12, %v421_v17   ;;  %425 = vst.msk [vmem:[#allocation2 + $0x6] sm:$0xc] %vm422_vm12, %v421_v17  }
  0x9a   :  { %427 = vst.msk [vmem:[#allocation2 + $0xc] sm:$0x30] %vm422_vm12, %v421_v17   ;;  %429 = vst.msk [vmem:[#allocation2 + $0x12] sm:$0xc0] %vm422_vm12, %v421_v17  }
  0x9d   :  { %v491_v18 = vld [vmem:[#allocation2 + $0x20] sm:$0x3]  ;;  %v498_v19 = vld [vmem:[#allocation2 + $0x28] sm:$0x3] }
  0x9e   :  { %v505_v20 = vld [vmem:[#allocation2 + $0x30] sm:$0x3]  ;;  %496 = vst [vmem:[#allocation0 + $0x8] sm:$0x3] %v491_v18  ;;  %503 = vst [vmem:[#allocation0 + $0xa] sm:$0x3] %v498_v19 }
  0x9f   :  { %510 = vst [vmem:[#allocation0 + $0xc] sm:$0x3] %v505_v20  ;;  %v512_v21 = vld [vmem:[#allocation2 + $0x38] sm:$0x3] }
  0xa0   :  { %517 = vst [vmem:[#allocation0 + $0xe] sm:$0x3] %v512_v21  ;;  %v466_v22 = vld [vmem:[#allocation2] sm:$0x3]  ;;  %v471_v23 = vld [vmem:[#allocation2 + $0x8] sm:$0x3] }
  0xa1   :  { %v477_v24 = vld [vmem:[#allocation2 + $0x10] sm:$0x3]  ;;  %469 = vst [vmem:[#allocation0] sm:$0x3] %v466_v22  ;;  %475 = vst [vmem:[#allocation0 + $0x2] sm:$0x3] %v471_v23 }
  0xa2   :  { %482 = vst [vmem:[#allocation0 + $0x4] sm:$0x3] %v477_v24  ;;  %v484_v25 = vld [vmem:[#allocation2 + $0x18] sm:$0x3] }
  0xa3   :  { %489 = vst [vmem:[#allocation0 + $0x6] sm:$0x3] %v484_v25 }
  0xa4   :  { %625 = shalt.err (!%p622_p4)
}
  0xa5   :  { %525 = dma.vmem_to_hbm [thread:$0]  %s523_s29, 256, %s966_s1, [#allocation1]  }
  0xa6   :  { %634 = dma.done.wait [#allocation1], 256  }
  0xa7   :  { %635 = vsyncadd [#allocation1], 4294967040 }
  0xa8   :  { %527 = vsyncpa [#allocation1], 1 }

// kernel: forward.2
= control target key start
LH: loop header
LB: loop body
LE: loop exit
PB: predicated region body
PF: predicated region fallthrough
CT: control target
= control target key end

     0   :  { %s1405_s12 = smov 0   ;;  %s1407_s13 = smov 0   ;;  %s1648_s0 = inlined_call_operand.vmem [shape: bf16[2,512,32], index: 0, kind: input, shape index: {}]   ;;  %s1649_s1 = inlined_call_operand.vmem [shape: bf16[2,32,128], index: 1, kind: input, shape index: {}]   ;;  %s1650_s2 = inlined_call_operand.vmem [shape: f32[2,1,128], index: 2, kind: input, shape index: {}]   ;;  %s1651_s3 = inlined_call_operand.vmem [shape: f32[2,512,128], index: 3, kind: output, shape index: {}]  }
   0x1   :  { %s1409_s14 = smov 0  }
   0x2 LB: > { %s25_s15 = sadd.s32 1, %s1379_s13  ;;  %p1118_p0 = scmp.ge.s32.totalorder %s1383_s14, 1  ;;  %s1383_s14 = sphi %s1409_s14, %s13_s14   ;;  %s1379_s13 = sphi %s1407_s13, %s1653_s13   ;;  %s1375_s12 = sphi %s1405_s12, %s1652_s12  }
   0x3   : > { %p27_p1 = scmp.ge.s32.totalorder %s25_s15, 2  ;;  %p176_p2 = scmp.lt.s32.totalorder %s1383_s14, 3 }
   0x5   : > { %s1655_s15 = smov (%p27_p1, %s25_s15), 0  ;;  %p177_p3 = pnand %p1118_p0, %p176_p2 }
   0x6   : > { %p217_p4 = scmp.lt.s32.totalorder (!%p177_p3), %s1375_s12, 1 }
   0x7   : > { %180 = sbr.rel (%p177_p3) target bundleno = 284 (0x11c), region = 32 }
   0xc   : > { %s1657_s12 = smov (!%p217_p4, %s1375_s12), 1  ;;  %vm492_vm0 = vcmask 261120  }
   0xd   : > { %s1195_s16 = sshll.u32 %s1657_s12, 4  ;;  %s1194_s17 = sshll.u32 %s1657_s12, 8 }
   0xe   : > { %s230_s20 = scalar_lea.vmem %s1649_s1, %s1195_s16  ;;  %s1433_s23 = scalar_lea.vmem %s1648_s0, %s1194_s17 }
   0xf   : > { %v1327_v0 = vld [vmem:[%s230_s20 + $0x8] sm:$0xff]   ;;  %v1328_v1 = vld [vmem:[%s230_s20] sm:$0xff]   ;;  %v1333_v6 = vld [vmem:[%s1433_s23 + $0x10] sm:$0xff]   ;;  %s233_s26 = scalar_lea.vmem %s1650_s2, %s1657_s12  ;;  %s1196_s27 = sshll.u32 %s1657_s12, 9 }
  0x10   : > { %1231 = vmatprep.subr.bf16.mxu0 %v1327_v0  ;;  %1299 = vmatprep.subr.bf16.mxu1 %v1327_v0  ;;  %v1329_v2 = vld [vmem:[%s1433_s23] sm:$0xff]   ;;  %v1331_v4 = vld [vmem:[%s1433_s23 + $0x8] sm:$0xff]   ;;  %v1334_v7 = vld [vmem:[%s1433_s23 + $0x90] sm:$0xff]   ;;  %s1511_s30 = scalar_lea.vmem %s1651_s3, %s1196_s27 }
  0x11   : > { %1232 = vmatpush3.bf16.msra.mxu0 %v1327_v0  ;;  %1301 = vmatpush3.bf16.msra.mxu1 %v1327_v0  ;;  %v1330_v3 = vld [vmem:[%s1433_s23 + $0x80] sm:$0xff]   ;;  %v1332_v5 = vld [vmem:[%s1433_s23 + $0x88] sm:$0xff]   ;;  %v1335_v8 = vld [vmem:[%s1433_s23 + $0x18] sm:$0xff]  }
  0x12   : > { %1233 = vmatprep.subr.bf16.mxu0 %v1328_v1  ;;  %1300 = vmatprep.subr.bf16.mxu1 %v1328_v1  ;;  %v1336_v9 = vld [vmem:[%s1433_s23 + $0x98] sm:$0xff]   ;;  %v1337_v10 = vld [vmem:[%s1433_s23 + $0x20] sm:$0xff]   ;;  %v1339_v12 = vld [vmem:[%s1433_s23 + $0x28] sm:$0xff]  }
  0x13   : > { %1235 = vmatprep.mubr.msk.bf16.mxu0 %vm492_vm0, %v1329_v2  ;;  %1267 = vmatprep.mubr.msk.bf16.mxu1 %vm492_vm0, %v1330_v3  ;;  %v1338_v11 = vld [vmem:[%s1433_s23 + $0xa0] sm:$0xff]   ;;  %v1340_v13 = vld [vmem:[%s1433_s23 + $0xa8] sm:$0xff]   ;;  %v1341_v14 = vld [vmem:[%s1433_s23 + $0x30] sm:$0xff]  }
  0x14   : > { %v1342_v15 = vld [vmem:[%s1433_s23 + $0xb0] sm:$0xff]   ;;  %v1343_v16 = vld [vmem:[%s1433_s23 + $0x38] sm:$0xff]   ;;  %v1345_v18 = vld [vmem:[%s1433_s23 + $0x40] sm:$0xff]  }
  0x15   : > { %1234 = vmatpush3.bf16.msra.mxu0 %v1328_v1  ;;  %1302 = vmatpush3.bf16.msra.mxu1 %v1328_v1  ;;  %v1344_v17 = vld [vmem:[%s1433_s23 + $0xb8] sm:$0xff]   ;;  %v1346_v19 = vld [vmem:[%s1433_s23 + $0xc0] sm:$0xff]   ;;  %v1347_v20 = vld [vmem:[%s1433_s23 + $0x48] sm:$0xff]  }
  0x16   : > { %v1348_v21 = vld [vmem:[%s1433_s23 + $0xc8] sm:$0xff]   ;;  %v1349_v22 = vld [vmem:[%s1433_s23 + $0x50] sm:$0xff]   ;;  %v1351_v24 = vld [vmem:[%s1433_s23 + $0x58] sm:$0xff]  }
  0x17   : > { %v1350_v23 = vld [vmem:[%s1433_s23 + $0xd0] sm:$0xff]   ;;  %v1352_v25 = vld [vmem:[%s1433_s23 + $0xd8] sm:$0xff]   ;;  %v1353_v26 = vld [vmem:[%s1433_s23 + $0x60] sm:$0xff]  }
  0x18   : > { %1236 = vmatmul.mubr.msk.bf16.vlgmr.msra.gmra.mxu0 %vm492_vm0, %v1331_v4  ;;  %1268 = vmatmul.mubr.msk.bf16.vlgmr.msra.gmra.mxu1 %vm492_vm0, %v1332_v5  ;;  %v1354_v27 = vld [vmem:[%s1433_s23 + $0xe0] sm:$0xff]   ;;  %v1355_v28 = vld [vmem:[%s1433_s23 + $0x68] sm:$0xff]   ;;  %v1357_v30 = vld [vmem:[%s1433_s23 + $0x70] sm:$0xff]  }
  0x19   : > { %1239 = vmatprep.mubr.msk.bf16.mxu0 %vm492_vm0, %v1333_v6  ;;  %1271 = vmatprep.mubr.msk.bf16.mxu1 %vm492_vm0, %v1334_v7  ;;  %v1356_v29 = vld [vmem:[%s1433_s23 + $0xe8] sm:$0xff]   ;;  %v1358_v31 = vld [vmem:[%s1433_s23 + $0xf0] sm:$0xff]   ;;  %v1359_v32 = vld [vmem:[%s1433_s23 + $0x78] sm:$0xff]  }
  0x1a   : > { %v1360_v33 = vld [vmem:[%s1433_s23 + $0xf8] sm:$0xff]   ;;  %v1503_v34 = vld [vmem:[%s233_s26] ss:$0 sm:$0xff] }
  0x20   : > { %1240 = vmatmul.mubr.msk.bf16.gmra.mxu0 %vm492_vm0, %v1335_v8  ;;  %1272 = vmatmul.mubr.msk.bf16.gmra.mxu1 %vm492_vm0, %v1336_v9 }
  0x21   : > { %1243 = vmatprep.mubr.msk.bf16.mxu0 %vm492_vm0, %v1337_v10  ;;  %1275 = vmatprep.mubr.msk.bf16.mxu1 %vm492_vm0, %v1338_v11 }
  0x28   : > { %1244 = vmatmul.mubr.msk.bf16.gmra.mxu0 %vm492_vm0, %v1339_v12  ;;  %1276 = vmatmul.mubr.msk.bf16.gmra.mxu1 %vm492_vm0, %v1340_v13 }
  0x29   : > { %1247 = vmatprep.mubr.msk.bf16.mxu0 %vm492_vm0, %v1341_v14  ;;  %1279 = vmatprep.mubr.msk.bf16.mxu1 %vm492_vm0, %v1342_v15 }
  0x30   : > { %1248 = vmatmul.mubr.msk.bf16.gmra.mxu0 %vm492_vm0, %v1343_v16  ;;  %1280 = vmatmul.mubr.msk.bf16.gmra.mxu1 %vm492_vm0, %v1344_v17 }
  0x31   : > { %1251 = vmatprep.mubr.msk.bf16.mxu0 %vm492_vm0, %v1345_v18  ;;  %1283 = vmatprep.mubr.msk.bf16.mxu1 %vm492_vm0, %v1346_v19 }
  0x38   : > { %1252 = vmatmul.mubr.msk.bf16.gmra.mxu0 %vm492_vm0, %v1347_v20  ;;  %1284 = vmatmul.mubr.msk.bf16.gmra.mxu1 %vm492_vm0, %v1348_v21 }
  0x39   : > { %1255 = vmatprep.mubr.msk.bf16.mxu0 %vm492_vm0, %v1349_v22  ;;  %1287 = vmatprep.mubr.msk.bf16.mxu1 %vm492_vm0, %v1350_v23 }
  0x40   : > { %1256 = vmatmul.mubr.msk.bf16.gmra.mxu0 %vm492_vm0, %v1351_v24  ;;  %1288 = vmatmul.mubr.msk.bf16.gmra.mxu1 %vm492_vm0, %v1352_v25 }
  0x41   : > { %1259 = vmatprep.mubr.msk.bf16.mxu0 %vm492_vm0, %v1353_v26  ;;  %1291 = vmatprep.mubr.msk.bf16.mxu1 %vm492_vm0, %v1354_v27 }
  0x48   : > { %1260 = vmatmul.mubr.msk.bf16.gmra.mxu0 %vm492_vm0, %v1355_v28  ;;  %1292 = vmatmul.mubr.msk.bf16.gmra.mxu1 %vm492_vm0, %v1356_v29 }
  0x49   : > { %1263 = vmatprep.mubr.msk.bf16.mxu0 %vm492_vm0, %v1357_v30  ;;  %1295 = vmatprep.mubr.msk.bf16.mxu1 %vm492_vm0, %v1358_v31 }
  0x50   : > { %1264 = vmatmul.mubr.msk.bf16.gmra.mxu0 %vm492_vm0, %v1359_v32  ;;  %1296 = vmatmul.mubr.msk.bf16.gmra.mxu1 %vm492_vm0, %v1360_v33 }
  0xd8   : > { %v1237_v35 = vpop.f32.mrf.mxu0  ;;  %v1269_v36 = vpop.f32.mrf.mxu1 }
  0xd9   : > { %v632_v37 = vadd.f32 %v1237_v35, %v1503_v34  ;;  %v760_v38 = vadd.f32 %v1269_v36, %v1503_v34 }
  0xda   : > { %v623_v39 = vpop.f32.mrf.mxu0  ;;  %v751_v40 = vpop.f32.mrf.mxu1 }
  0xdb   : > { %v880_v41 = vmax.f32 %v632_v37, 0.0  ;;  %v912_v42 = vmax.f32 %v760_v38, 0.0  ;;  %v624_v43 = vadd.f32 %v1503_v34, %v623_v39  ;;  %v752_v44 = vadd.f32 %v1503_v34, %v751_v40 }
  0xdc   : > { %v1238_v45 = vpop.f32.mrf.mxu0  ;;  %v1270_v46 = vpop.f32.mrf.mxu1 }
  0xdd   : > { %944 = vst [vmem:[%s1511_s30 + $0x10] sm:$0xff] %v880_v41  ;;  %976 = vst [vmem:[%s1511_s30 + $0x110] sm:$0xff] %v912_v42  ;;  %v878_v47 = vmax.f32 %v624_v43, 0.0  ;;  %v910_v48 = vmax.f32 %v752_v44, 0.0  ;;  %v635_v49 = vadd.f32 %v1238_v45, %v1503_v34  ;;  %v763_v50 = vadd.f32 %v1270_v46, %v1503_v34 }
  0xde   : > { %v626_v51 = vpop.f32.mrf.mxu0  ;;  %v754_v52 = vpop.f32.mrf.mxu1 }
  0xdf   : > { %942 = vst [vmem:[%s1511_s30] sm:$0xff] %v878_v47  ;;  %974 = vst [vmem:[%s1511_s30 + $0x100] sm:$0xff] %v910_v48  ;;  %v881_v53 = vmax.f32 %v635_v49, 0.0  ;;  %v913_v54 = vmax.f32 %v763_v50, 0.0  ;;  %v627_v55 = vadd.f32 %v1503_v34, %v626_v51  ;;  %v755_v56 = vadd.f32 %v1503_v34, %v754_v52 }
  0xe0   : > { %v1241_v57 = vpop.f32.mrf.mxu0  ;;  %v1273_v58 = vpop.f32.mrf.mxu1 }
  0xe1   : > { %945 = vst [vmem:[%s1511_s30 + $0x18] sm:$0xff] %v881_v53  ;;  %977 = vst [vmem:[%s1511_s30 + $0x118] sm:$0xff] %v913_v54  ;;  %v879_v59 = vmax.f32 %v627_v55, 0.0  ;;  %v911_v60 = vmax.f32 %v755_v56, 0.0  ;;  %v648_v61 = vadd.f32 %v1241_v57, %v1503_v34  ;;  %v776_v62 = vadd.f32 %v1273_v58, %v1503_v34 }
  0xe2   : > { %v639_v63 = vpop.f32.mrf.mxu0  ;;  %v767_v0 = vpop.f32.mrf.mxu1 }
  0xe3   : > { %943 = vst [vmem:[%s1511_s30 + $0x8] sm:$0xff] %v879_v59  ;;  %975 = vst [vmem:[%s1511_s30 + $0x108] sm:$0xff] %v911_v60  ;;  %v884_v1 = vmax.f32 %v648_v61, 0.0  ;;  %v916_v2 = vmax.f32 %v776_v62, 0.0  ;;  %v640_v3 = vadd.f32 %v1503_v34, %v639_v63  ;;  %v768_v4 = vadd.f32 %v1503_v34, %v767_v0 }
  0xe4   : > { %v1242_v5 = vpop.f32.mrf.mxu0  ;;  %v1274_v6 = vpop.f32.mrf.mxu1 }
  0xe5   : > { %948 = vst [vmem:[%s1511_s30 + $0x30] sm:$0xff] %v884_v1  ;;  %980 = vst [vmem:[%s1511_s30 + $0x130] sm:$0xff] %v916_v2  ;;  %v882_v7 = vmax.f32 %v640_v3, 0.0  ;;  %v914_v8 = vmax.f32 %v768_v4, 0.0  ;;  %v651_v9 = vadd.f32 %v1242_v5, %v1503_v34  ;;  %v779_v10 = vadd.f32 %v1274_v6, %v1503_v34 }
  0xe6   : > { %v642_v11 = vpop.f32.mrf.mxu0  ;;  %v770_v12 = vpop.f32.mrf.mxu1 }
  0xe7   : > { %946 = vst [vmem:[%s1511_s30 + $0x20] sm:$0xff] %v882_v7  ;;  %978 = vst [vmem:[%s1511_s30 + $0x120] sm:$0xff] %v914_v8  ;;  %v885_v13 = vmax.f32 %v651_v9, 0.0  ;;  %v917_v14 = vmax.f32 %v779_v10, 0.0  ;;  %v643_v15 = vadd.f32 %v1503_v34, %v642_v11  ;;  %v771_v16 = vadd.f32 %v1503_v34, %v770_v12 }
  0xe8   : > { %v1245_v17 = vpop.f32.mrf.mxu0  ;;  %v1277_v18 = vpop.f32.mrf.mxu1 }
  0xe9   : > { %949 = vst [vmem:[%s1511_s30 + $0x38] sm:$0xff] %v885_v13  ;;  %981 = vst [vmem:[%s1511_s30 + $0x138] sm:$0xff] %v917_v14  ;;  %v883_v19 = vmax.f32 %v643_v15, 0.0  ;;  %v915_v20 = vmax.f32 %v771_v16, 0.0  ;;  %v664_v21 = vadd.f32 %v1245_v17, %v1503_v34  ;;  %v792_v22 = vadd.f32 %v1277_v18, %v1503_v34 }
  0xea   : > { %v655_v23 = vpop.f32.mrf.mxu0  ;;  %v783_v24 = vpop.f32.mrf.mxu1 }
  0xeb   : > { %947 = vst [vmem:[%s1511_s30 + $0x28] sm:$0xff] %v883_v19  ;;  %979 = vst [vmem:[%s1511_s30 + $0x128] sm:$0xff] %v915_v20  ;;  %v888_v25 = vmax.f32 %v664_v21, 0.0  ;;  %v920_v26 = vmax.f32 %v792_v22, 0.0  ;;  %v656_v27 = vadd.f32 %v1503_v34, %v655_v23  ;;  %v784_v28 = vadd.f32 %v1503_v34, %v783_v24 }
  0xec   : > { %v1246_v29 = vpop.f32.mrf.mxu0  ;;  %v1278_v30 = vpop.f32.mrf.mxu1 }
  0xed   : > { %952 = vst [vmem:[%s1511_s30 + $0x50] sm:$0xff] %v888_v25  ;;  %984 = vst [vmem:[%s1511_s30 + $0x150] sm:$0xff] %v920_v26  ;;  %v886_v31 = vmax.f32 %v656_v27, 0.0  ;;  %v918_v32 = vmax.f32 %v784_v28, 0.0  ;;  %v667_v33 = vadd.f32 %v1246_v29, %v1503_v34  ;;  %v795_v35 = vadd.f32 %v1278_v30, %v1503_v34 }
  0xee   : > { %v658_v36 = vpop.f32.mrf.mxu0  ;;  %v786_v37 = vpop.f32.mrf.mxu1 }
  0xef   : > { %950 = vst [vmem:[%s1511_s30 + $0x40] sm:$0xff] %v886_v31  ;;  %982 = vst [vmem:[%s1511_s30 + $0x140] sm:$0xff] %v918_v32  ;;  %v889_v38 = vmax.f32 %v667_v33, 0.0  ;;  %v921_v39 = vmax.f32 %v795_v35, 0.0  ;;  %v659_v40 = vadd.f32 %v1503_v34, %v658_v36  ;;  %v787_v41 = vadd.f32 %v1503_v34, %v786_v37 }
  0xf0   : > { %v1249_v42 = vpop.f32.mrf.mxu0  ;;  %v1281_v43 = vpop.f32.mrf.mxu1 }
  0xf1   : > { %953 = vst [vmem:[%s1511_s30 + $0x58] sm:$0xff] %v889_v38  ;;  %985 = vst [vmem:[%s1511_s30 + $0x158] sm:$0xff] %v921_v39  ;;  %v887_v44 = vmax.f32 %v659_v40, 0.0  ;;  %v919_v45 = vmax.f32 %v787_v41, 0.0  ;;  %v680_v46 = vadd.f32 %v1249_v42, %v1503_v34  ;;  %v808_v47 = vadd.f32 %v1281_v43, %v1503_v34 }
  0xf2   : > { %v671_v48 = vpop.f32.mrf.mxu0  ;;  %v799_v49 = vpop.f32.mrf.mxu1 }
  0xf3   : > { %951 = vst [vmem:[%s1511_s30 + $0x48] sm:$0xff] %v887_v44  ;;  %983 = vst [vmem:[%s1511_s30 + $0x148] sm:$0xff] %v919_v45  ;;  %v892_v50 = vmax.f32 %v680_v46, 0.0  ;;  %v924_v51 = vmax.f32 %v808_v47, 0.0  ;;  %v672_v52 = vadd.f32 %v1503_v34, %v671_v48  ;;  %v800_v53 = vadd.f32 %v1503_v34, %v799_v49 }
  0xf4   : > { %v1250_v54 = vpop.f32.mrf.mxu0  ;;  %v1282_v55 = vpop.f32.mrf.mxu1 }
  0xf5   : > { %956 = vst [vmem:[%s1511_s30 + $0x70] sm:$0xff] %v892_v50  ;;  %988 = vst [vmem:[%s1511_s30 + $0x170] sm:$0xff] %v924_v51  ;;  %v890_v56 = vmax.f32 %v672_v52, 0.0  ;;  %v922_v57 = vmax.f32 %v800_v53, 0.0  ;;  %v683_v58 = vadd.f32 %v1250_v54, %v1503_v34  ;;  %v811_v59 = vadd.f32 %v1282_v55, %v1503_v34 }
  0xf6   : > { %v674_v60 = vpop.f32.mrf.mxu0  ;;  %v802_v61 = vpop.f32.mrf.mxu1 }
  0xf7   : > { %954 = vst [vmem:[%s1511_s30 + $0x60] sm:$0xff] %v890_v56  ;;  %986 = vst [vmem:[%s1511_s30 + $0x160] sm:$0xff] %v922_v57  ;;  %v893_v62 = vmax.f32 %v683_v58, 0.0  ;;  %v925_v63 = vmax.f32 %v811_v59, 0.0  ;;  %v675_v0 = vadd.f32 %v1503_v34, %v674_v60  ;;  %v803_v1 = vadd.f32 %v1503_v34, %v802_v61 }
  0xf8   : > { %v1253_v2 = vpop.f32.mrf.mxu0  ;;  %v1285_v3 = vpop.f32.mrf.mxu1 }
  0xf9   : > { %957 = vst [vmem:[%s1511_s30 + $0x78] sm:$0xff] %v893_v62  ;;  %989 = vst [vmem:[%s1511_s30 + $0x178] sm:$0xff] %v925_v63  ;;  %v891_v4 = vmax.f32 %v675_v0, 0.0  ;;  %v923_v5 = vmax.f32 %v803_v1, 0.0  ;;  %v696_v6 = vadd.f32 %v1253_v2, %v1503_v34  ;;  %v824_v7 = vadd.f32 %v1285_v3, %v1503_v34 }
  0xfa   : > { %v687_v8 = vpop.f32.mrf.mxu0  ;;  %v815_v9 = vpop.f32.mrf.mxu1 }
  0xfb   : > { %955 = vst [vmem:[%s1511_s30 + $0x68] sm:$0xff] %v891_v4  ;;  %987 = vst [vmem:[%s1511_s30 + $0x168] sm:$0xff] %v923_v5  ;;  %v896_v10 = vmax.f32 %v696_v6, 0.0  ;;  %v928_v11 = vmax.f32 %v824_v7, 0.0  ;;  %v688_v12 = vadd.f32 %v1503_v34, %v687_v8  ;;  %v816_v13 = vadd.f32 %v1503_v34, %v815_v9 }
  0xfc   : > { %v1254_v14 = vpop.f32.mrf.mxu0  ;;  %v1286_v15 = vpop.f32.mrf.mxu1 }
  0xfd   : > { %960 = vst [vmem:[%s1511_s30 + $0x90] sm:$0xff] %v896_v10  ;;  %992 = vst [vmem:[%s1511_s30 + $0x190] sm:$0xff] %v928_v11  ;;  %v894_v16 = vmax.f32 %v688_v12, 0.0  ;;  %v926_v17 = vmax.f32 %v816_v13, 0.0  ;;  %v699_v18 = vadd.f32 %v1254_v14, %v1503_v34  ;;  %v827_v19 = vadd.f32 %v1286_v15, %v1503_v34 }
  0xfe   : > { %v690_v20 = vpop.f32.mrf.mxu0  ;;  %v818_v21 = vpop.f32.mrf.mxu1 }
  0xff   : > { %958 = vst [vmem:[%s1511_s30 + $0x80] sm:$0xff] %v894_v16  ;;  %990 = vst [vmem:[%s1511_s30 + $0x180] sm:$0xff] %v926_v17  ;;  %v897_v22 = vmax.f32 %v699_v18, 0.0  ;;  %v929_v23 = vmax.f32 %v827_v19, 0.0  ;;  %v691_v24 = vadd.f32 %v1503_v34, %v690_v20  ;;  %v819_v25 = vadd.f32 %v1503_v34, %v818_v21 }
 0x100   : > { %v1257_v26 = vpop.f32.mrf.mxu0  ;;  %v1289_v27 = vpop.f32.mrf.mxu1 }
 0x101   : > { %961 = vst [vmem:[%s1511_s30 + $0x98] sm:$0xff] %v897_v22  ;;  %993 = vst [vmem:[%s1511_s30 + $0x198] sm:$0xff] %v929_v23  ;;  %v895_v28 = vmax.f32 %v691_v24, 0.0  ;;  %v927_v29 = vmax.f32 %v819_v25, 0.0  ;;  %v712_v30 = vadd.f32 %v1257_v26, %v1503_v34  ;;  %v840_v31 = vadd.f32 %v1289_v27, %v1503_v34 }
 0x102   : > { %v703_v32 = vpop.f32.mrf.mxu0  ;;  %v831_v33 = vpop.f32.mrf.mxu1 }
 0x103   : > { %959 = vst [vmem:[%s1511_s30 + $0x88] sm:$0xff] %v895_v28  ;;  %991 = vst [vmem:[%s1511_s30 + $0x188] sm:$0xff] %v927_v29  ;;  %v900_v35 = vmax.f32 %v712_v30, 0.0  ;;  %v932_v36 = vmax.f32 %v840_v31, 0.0  ;;  %v704_v37 = vadd.f32 %v1503_v34, %v703_v32  ;;  %v832_v38 = vadd.f32 %v1503_v34, %v831_v33 }
 0x104   : > { %v1258_v39 = vpop.f32.mrf.mxu0  ;;  %v1290_v40 = vpop.f32.mrf.mxu1 }
 0x105   : > { %964 = vst [vmem:[%s1511_s30 + $0xb0] sm:$0xff] %v900_v35  ;;  %996 = vst [vmem:[%s1511_s30 + $0x1b0] sm:$0xff] %v932_v36  ;;  %v898_v41 = vmax.f32 %v704_v37, 0.0  ;;  %v930_v42 = vmax.f32 %v832_v38, 0.0  ;;  %v715_v43 = vadd.f32 %v1258_v39, %v1503_v34  ;;  %v843_v44 = vadd.f32 %v1290_v40, %v1503_v34 }
 0x106   : > { %v706_v45 = vpop.f32.mrf.mxu0  ;;  %v834_v46 = vpop.f32.mrf.mxu1 }
 0x107   : > { %962 = vst [vmem:[%s1511_s30 + $0xa0] sm:$0xff] %v898_v41  ;;  %994 = vst [vmem:[%s1511_s30 + $0x1a0] sm:$0xff] %v930_v42  ;;  %v901_v47 = vmax.f32 %v715_v43, 0.0  ;;  %v933_v48 = vmax.f32 %v843_v44, 0.0  ;;  %v707_v49 = vadd.f32 %v1503_v34, %v706_v45  ;;  %v835_v50 = vadd.f32 %v1503_v34, %v834_v46 }
 0x108   : > { %v1261_v51 = vpop.f32.mrf.mxu0  ;;  %v1293_v52 = vpop.f32.mrf.mxu1 }
 0x109   : > { %965 = vst [vmem:[%s1511_s30 + $0xb8] sm:$0xff] %v901_v47  ;;  %997 = vst [vmem:[%s1511_s30 + $0x1b8] sm:$0xff] %v933_v48  ;;  %v899_v53 = vmax.f32 %v707_v49, 0.0  ;;  %v931_v54 = vmax.f32 %v835_v50, 0.0  ;;  %v728_v55 = vadd.f32 %v1261_v51, %v1503_v34  ;;  %v856_v56 = vadd.f32 %v1293_v52, %v1503_v34 }
 0x10a   : > { %v719_v57 = vpop.f32.mrf.mxu0  ;;  %v847_v58 = vpop.f32.mrf.mxu1 }
 0x10b   : > { %963 = vst [vmem:[%s1511_s30 + $0xa8] sm:$0xff] %v899_v53  ;;  %995 = vst [vmem:[%s1511_s30 + $0x1a8] sm:$0xff] %v931_v54  ;;  %v904_v59 = vmax.f32 %v728_v55, 0.0  ;;  %v936_v60 = vmax.f32 %v856_v56, 0.0  ;;  %v720_v61 = vadd.f32 %v1503_v34, %v719_v57  ;;  %v848_v62 = vadd.f32 %v1503_v34, %v847_v58 }
 0x10c   : > { %v1262_v63 = vpop.f32.mrf.mxu0  ;;  %v1294_v0 = vpop.f32.mrf.mxu1 }
 0x10d   : > { %968 = vst [vmem:[%s1511_s30 + $0xd0] sm:$0xff] %v904_v59  ;;  %1000 = vst [vmem:[%s1511_s30 + $0x1d0] sm:$0xff] %v936_v60  ;;  %v902_v1 = vmax.f32 %v720_v61, 0.0  ;;  %v934_v2 = vmax.f32 %v848_v62, 0.0  ;;  %v731_v3 = vadd.f32 %v1262_v63, %v1503_v34  ;;  %v859_v4 = vadd.f32 %v1294_v0, %v1503_v34 }
 0x10e   : > { %v722_v5 = vpop.f32.mrf.mxu0  ;;  %v850_v6 = vpop.f32.mrf.mxu1 }
 0x10f   : > { %966 = vst [vmem:[%s1511_s30 + $0xc0] sm:$0xff] %v902_v1  ;;  %998 = vst [vmem:[%s1511_s30 + $0x1c0] sm:$0xff] %v934_v2  ;;  %v905_v7 = vmax.f32 %v731_v3, 0.0  ;;  %v937_v8 = vmax.f32 %v859_v4, 0.0  ;;  %v723_v9 = vadd.f32 %v1503_v34, %v722_v5  ;;  %v851_v10 = vadd.f32 %v1503_v34, %v850_v6 }
 0x110   : > { %v1265_v11 = vpop.f32.mrf.mxu0  ;;  %v1297_v12 = vpop.f32.mrf.mxu1 }
 0x111   : > { %969 = vst [vmem:[%s1511_s30 + $0xd8] sm:$0xff] %v905_v7  ;;  %1001 = vst [vmem:[%s1511_s30 + $0x1d8] sm:$0xff] %v937_v8  ;;  %v903_v13 = vmax.f32 %v723_v9, 0.0  ;;  %v935_v14 = vmax.f32 %v851_v10, 0.0  ;;  %v744_v15 = vadd.f32 %v1265_v11, %v1503_v34  ;;  %v872_v16 = vadd.f32 %v1297_v12, %v1503_v34 }
 0x112   : > { %v735_v17 = vpop.f32.mrf.mxu0  ;;  %v863_v18 = vpop.f32.mrf.mxu1 }
 0x113   : > { %967 = vst [vmem:[%s1511_s30 + $0xc8] sm:$0xff] %v903_v13  ;;  %999 = vst [vmem:[%s1511_s30 + $0x1c8] sm:$0xff] %v935_v14  ;;  %v908_v19 = vmax.f32 %v744_v15, 0.0  ;;  %v940_v20 = vmax.f32 %v872_v16, 0.0  ;;  %v736_v21 = vadd.f32 %v1503_v34, %v735_v17  ;;  %v864_v22 = vadd.f32 %v1503_v34, %v863_v18 }
 0x114   : > { %v1266_v23 = vpop.f32.mrf.mxu0  ;;  %v1298_v24 = vpop.f32.mrf.mxu1 }
 0x115   : > { %972 = vst [vmem:[%s1511_s30 + $0xf0] sm:$0xff] %v908_v19  ;;  %1004 = vst [vmem:[%s1511_s30 + $0x1f0] sm:$0xff] %v940_v20  ;;  %v906_v25 = vmax.f32 %v736_v21, 0.0  ;;  %v938_v26 = vmax.f32 %v864_v22, 0.0  ;;  %v747_v27 = vadd.f32 %v1266_v23, %v1503_v34  ;;  %v875_v28 = vadd.f32 %v1298_v24, %v1503_v34 }
 0x116   : > { %v738_v29 = vpop.f32.mrf.mxu0  ;;  %v866_v30 = vpop.f32.mrf.mxu1 }
 0x117   : > { %970 = vst [vmem:[%s1511_s30 + $0xe0] sm:$0xff] %v906_v25  ;;  %1002 = vst [vmem:[%s1511_s30 + $0x1e0] sm:$0xff] %v938_v26  ;;  %v909_v31 = vmax.f32 %v747_v27, 0.0  ;;  %v941_v32 = vmax.f32 %v875_v28, 0.0  ;;  %v739_v33 = vadd.f32 %v1503_v34, %v738_v29  ;;  %v867_v35 = vadd.f32 %v1503_v34, %v866_v30 }
 0x119   : > { %973 = vst [vmem:[%s1511_s30 + $0xf8] sm:$0xff] %v909_v31  ;;  %1005 = vst [vmem:[%s1511_s30 + $0x1f8] sm:$0xff] %v941_v32  ;;  %v907_v36 = vmax.f32 %v739_v33, 0.0  ;;  %v939_v37 = vmax.f32 %v867_v35, 0.0 }
 0x11b   : > { %971 = vst [vmem:[%s1511_s30 + $0xe8] sm:$0xff] %v907_v36  ;;  %1003 = vst [vmem:[%s1511_s30 + $0x1e8] sm:$0xff] %v939_v37 }
 0x11c PF: > { %s13_s14 = sadd.s32 1, %s1383_s14   ;;  %s1652_s12 = smov %s1379_s13 }
 0x11d   : > { %p10_p5 = scmp.ge.s32.totalorder %s13_s14, 4   ;;  %s1653_s13 = smov %s1655_s15 }
 0x11f   :  { %12 = sbr.rel (!%p10_p5) target bundleno = 2 (0x2), region = 68 }

// kernel: forward.3
= control target key start
LH: loop header
LB: loop body
LE: loop exit
PB: predicated region body
PF: predicated region fallthrough
CT: control target
= control target key end

     0   :  { %s1567_s18 = smov 0   ;;  %s1683_s0 = inlined_call_operand.vmem [shape: bf16[2,2,1024], index: 0, kind: input, shape index: {}]   ;;  %s1684_s1 = inlined_call_operand.vmem [shape: bf16[2,1024,128], index: 1, kind: input, shape index: {}]   ;;  %s1685_s2 = inlined_call_operand.vmem [shape: f32[2,1,128], index: 2, kind: input, shape index: {}]   ;;  %s1686_s3 = inlined_call_operand.vmem [shape: bf16[2,128,128], index: 3, kind: input, shape index: {}]   ;;  %s1687_s4 = inlined_call_operand.vmem [shape: f32[2,1,128], index: 4, kind: input, shape index: {}]   ;;  %s1688_s5 = inlined_call_operand.vmem [shape: f32[2,2,128], index: 5, kind: output, shape index: {}]  }
   0x1 LB: > { %s1236_s19 = sadd.s32 4294967295, %s1532_s18   ;;  %p1240_p0 = scmp.ge.s32.totalorder %s1532_s18, 1  ;;  %s1532_s18 = sphi %s1567_s18, %s15_s18  }
   0x2   : > { %p222_p1 = scmp.lt.s32.totalorder %s1532_s18, 3 }
   0x4   : > { %p223_p2 = pnand %p1240_p0, %p222_p1 }
   0x5   : > { %p264_p3 = scmp.lt.s32.totalorder (!%p223_p2), %s1236_s19, 1 }
   0x6   : > { %226 = sbr.rel (%p223_p2) target bundleno = 484 (0x1e4), region = 40 }
   0xb   : > { %s1690_s19 = smov (!%p264_p3, %s1236_s19), 1  ;;  %v1534_v22 = vmov 1966171168   ;;  %v430_v24 = vlaneseq  ;;  %vm1536_vm0 = vmmov 0  }
   0xc   : > { %s1323_s20 = sshll.u32 %s1690_s19, 9  ;;  %v428_v23 = vunpack.c.l.s4 %v1534_v22  ;;  %s1241_s24 = sshll.u32 %s1690_s19, 3 }
   0xd   : > { %s1581_s23 = scalar_lea.vmem %s1684_s1, %s1323_s20  ;;  %v431_v30 = vshrl.u32 %v430_v24, 7  ;;  %s267_s27 = scalar_lea.vmem %s1683_s0, %s1241_s24 }
   0xe   : > { %v1453_v0 = vld [vmem:[%s1581_s23 + $0x78] sm:$0xff]   ;;  %v1457_v4 = vld [vmem:[%s1581_s23 + $0x70] sm:$0xff]   ;;  %v1461_v8 = vld [vmem:[%s1581_s23 + $0x68] sm:$0xff]   ;;  %v429_v29 = vunpack.c.0.s8 %v428_v23  ;;  %s1324_s28 = sshll.u32 %s1690_s19, 6  ;;  %s275_s9 = scalar_lea.vmem %s1685_s2, %s1690_s19 }
   0xf   : > { %v1454_v1 = vld [vmem:[%s1581_s23 + $0xf8] sm:$0xff]   ;;  %1325 = vmatprep.subr.bf16.mxu0 %v1453_v0  ;;  %v1458_v5 = vld [vmem:[%s1581_s23 + $0xf0] sm:$0xff]   ;;  %v1462_v9 = vld [vmem:[%s1581_s23 + $0xe8] sm:$0xff]   ;;  %s280_s6 = scalar_lea.vmem %s1686_s3, %s1324_s28  ;;  %s283_s12 = scalar_lea.vmem %s1687_s4, %s1690_s19 }
  0x10   : > { %v1455_v2 = vld [vmem:[%s1581_s23 + $0x38] sm:$0xff]   ;;  %1347 = vmatprep.subr.bf16.mxu1 %v1454_v1  ;;  %v1459_v6 = vld [vmem:[%s1581_s23 + $0x30] sm:$0xff]   ;;  %v1463_v10 = vld [vmem:[%s1581_s23 + $0x28] sm:$0xff]   ;;  %v1617_v35 = vsub.s32 %v429_v29, %v431_v30  ;;  %s1246_s13 = sshll.u32 %s1690_s19, 1 }
  0x11   : > { %v1456_v3 = vld [vmem:[%s1581_s23 + $0xb8] sm:$0xff]   ;;  %1326 = vmatpush3.bf16.msra.mxu0 %v1455_v2  ;;  %v1460_v7 = vld [vmem:[%s1581_s23 + $0xb0] sm:$0xff]   ;;  %v1464_v11 = vld [vmem:[%s1581_s23 + $0xa8] sm:$0xff]   ;;  %s287_s16 = scalar_lea.vmem %s1688_s5, %s1246_s13 }
  0x12   : > { %1348 = vmatpush3.bf16.msra.mxu1 %v1456_v3  ;;  %1327 = vmatprep.subr.bf16.mxu0 %v1457_v4  ;;  %v1465_v12 = vld [vmem:[%s1581_s23 + $0x60] sm:$0xff]   ;;  %v1469_v16 = vld [vmem:[%s1581_s23 + $0x58] sm:$0xff]   ;;  %v1473_v20 = vld [vmem:[%s1581_s23 + $0x50] sm:$0xff]  }
  0x13   : > { %1349 = vmatprep.subr.bf16.mxu1 %v1458_v5  ;;  %v1466_v13 = vld [vmem:[%s1581_s23 + $0xe0] sm:$0xff]   ;;  %v1470_v17 = vld [vmem:[%s1581_s23 + $0xd8] sm:$0xff]   ;;  %v1474_v21 = vld [vmem:[%s1581_s23 + $0xd0] sm:$0xff]  }
  0x14   : > { %v1467_v14 = vld [vmem:[%s1581_s23 + $0x20] sm:$0xff]   ;;  %v1471_v18 = vld [vmem:[%s1581_s23 + $0x18] sm:$0xff]   ;;  %v1475_v25 = vld [vmem:[%s1581_s23 + $0x10] sm:$0xff]  }
  0x15   : > { %1328 = vmatpush3.bf16.msra.mxu0 %v1459_v6  ;;  %v1468_v15 = vld [vmem:[%s1581_s23 + $0xa0] sm:$0xff]   ;;  %v1472_v19 = vld [vmem:[%s1581_s23 + $0x98] sm:$0xff]   ;;  %v1476_v26 = vld [vmem:[%s1581_s23 + $0x90] sm:$0xff]  }
  0x16   : > { %1350 = vmatpush3.bf16.msra.mxu1 %v1460_v7  ;;  %1329 = vmatprep.subr.bf16.mxu0 %v1461_v8  ;;  %v1477_v27 = vld [vmem:[%s1581_s23 + $0x48] sm:$0xff]   ;;  %v1481_v33 = vld [vmem:[%s1581_s23 + $0x40] sm:$0xff]   ;;  %v1486_v41 = vld [vmem:[%s1581_s23 + $0x178] sm:$0xff]  }
  0x17   : > { %1351 = vmatprep.subr.bf16.mxu1 %v1462_v9  ;;  %v1478_v28 = vld [vmem:[%s1581_s23 + $0xc8] sm:$0xff]   ;;  %v1482_v34 = vld [vmem:[%s1581_s23 + $0xc0] sm:$0xff]   ;;  %v1487_v42 = vld [vmem:[%s1581_s23 + $0x1f8] sm:$0xff]  }
  0x18   : > { %v1479_v31 = vld [vmem:[%s1581_s23 + $0x8] sm:$0xff]   ;;  %v1483_v36 = vld [vmem:[%s1581_s23] sm:$0xff]   ;;  %v1488_v47 = vld [vmem:[%s1581_s23 + $0x138] sm:$0xff]  }
  0x19   : > { %1330 = vmatpush3.bf16.msra.mxu0 %v1463_v10  ;;  %v1480_v32 = vld [vmem:[%s1581_s23 + $0x88] sm:$0xff]   ;;  %v1484_v37 = vld [vmem:[%s1581_s23 + $0x80] sm:$0xff]   ;;  %v1490_v50 = vld [vmem:[%s1581_s23 + $0x170] sm:$0xff]  }
  0x1a   : > { %1352 = vmatpush3.bf16.msra.mxu1 %v1464_v11  ;;  %1331 = vmatprep.subr.bf16.mxu0 %v1465_v12  ;;  %v289_v38 = vld [vmem:[%s267_s27] sm:$0xff]  ;;  %v1489_v52 = vld [vmem:[%s1581_s23 + $0x1b8] sm:$0xff]   ;;  %v1491_v54 = vld [vmem:[%s1581_s23 + $0x1f0] sm:$0xff]  }
  0x1b   : > { %1353 = vmatprep.subr.bf16.mxu1 %v1466_v13  ;;  %v426_v39 = vcombine.high %v289_v38, %v289_v38  ;;  %v433_v40 = vrot.slane %v289_v38, %v1617_v35  ;;  %v1492_v55 = vld [vmem:[%s1581_s23 + $0x130] sm:$0xff]   ;;  %v1494_v57 = vld [vmem:[%s1581_s23 + $0x168] sm:$0xff]   ;;  %v1498_v61 = vld [vmem:[%s1581_s23 + $0x160] sm:$0xff]  }
  0x1c   : > { %v1493_v58 = vld [vmem:[%s1581_s23 + $0x1b0] sm:$0xff]   ;;  %v1495_v59 = vld [vmem:[%s1581_s23 + $0x1e8] sm:$0xff]   ;;  %v1499_v63 = vld [vmem:[%s1581_s23 + $0x1e0] sm:$0xff]  }
  0x1d   : > { %1332 = vmatpush3.bf16.msra.mxu0 %v1467_v14  ;;  %v441_v43 = vcombine.high %v433_v40, %v433_v40  ;;  %v449_v44 = vrot.slane %v433_v40, %v1617_v35  ;;  %v1626_v45 = vrot.slane %v426_v39, %v1617_v35  ;;  %v1496_v60 = vld [vmem:[%s1581_s23 + $0x128] sm:$0xff]   ;;  %v1500_v0 = vld [vmem:[%s1581_s23 + $0x120] sm:$0xff]   ;;  %v1502_v1 = vld [vmem:[%s1581_s23 + $0x158] sm:$0xff]  }
  0x1e   : > { %1354 = vmatpush3.bf16.msra.mxu1 %v1468_v15  ;;  %1333 = vmatprep.subr.bf16.mxu0 %v1469_v16  ;;  %v1497_v62 = vld [vmem:[%s1581_s23 + $0x1a8] sm:$0xff]   ;;  %v1501_v2 = vld [vmem:[%s1581_s23 + $0x1a0] sm:$0xff]   ;;  %v1503_v3 = vld [vmem:[%s1581_s23 + $0x1d8] sm:$0xff]  }
  0x1f   : > { %1355 = vmatprep.subr.bf16.mxu1 %v1470_v17  ;;  %v463_v46 = vrot.slane %v441_v43, %v1617_v35  ;;  %v442_v48 = vcombine.high %v1626_v45, %v1626_v45  ;;  %v471_v49 = vcombine.high %v449_v44, %v449_v44  ;;  %v1504_v4 = vld [vmem:[%s1581_s23 + $0x118] sm:$0xff]   ;;  %v1506_v5 = vld [vmem:[%s1581_s23 + $0x150] sm:$0xff]   ;;  %v1510_v9 = vld [vmem:[%s1581_s23 + $0x148] sm:$0xff]   ;;  %v456_v17 = vrot.slane %v1626_v45, %v1617_v35 }
  0x20   : > { %v1505_v6 = vld [vmem:[%s1581_s23 + $0x198] sm:$0xff]   ;;  %v1507_v7 = vld [vmem:[%s1581_s23 + $0x1d0] sm:$0xff]   ;;  %v1511_v11 = vld [vmem:[%s1581_s23 + $0x1c8] sm:$0xff]  }
  0x21   : > { %1334 = vmatpush3.bf16.msra.mxu0 %v1471_v18  ;;  %899 = vmatprep.mubr.bf16.mxu0 %v463_v46  ;;  %v473_v51 = vcombine.high %v463_v46, %v463_v46  ;;  %v470_v53 = vrot.slane %v442_v48, %v1617_v35  ;;  %v1508_v8 = vld [vmem:[%s1581_s23 + $0x110] sm:$0xff]   ;;  %v1512_v12 = vld [vmem:[%s1581_s23 + $0x108] sm:$0xff]   ;;  %v1514_v13 = vld [vmem:[%s1581_s23 + $0x140] sm:$0xff]  }
  0x22   : > { %1356 = vmatpush3.bf16.msra.mxu1 %v1472_v19  ;;  %1335 = vmatprep.subr.bf16.mxu0 %v1473_v20  ;;  %v1509_v10 = vld [vmem:[%s1581_s23 + $0x190] sm:$0xff]   ;;  %v1513_v14 = vld [vmem:[%s1581_s23 + $0x188] sm:$0xff]   ;;  %v1515_v15 = vld [vmem:[%s1581_s23 + $0x1c0] sm:$0xff]   ;;  %v472_v19 = vcombine.high %v456_v17, %v456_v17  ;;  %v1535_v20 = vmov 0.0  }
  0x23   : > { %1357 = vmatprep.subr.bf16.mxu1 %v1474_v21  ;;  %939 = vmatprep.mubr.bf16.mxu1 %v473_v51  ;;  %v474_v56 = vcombine.high %v470_v53, %v470_v53  ;;  %v1516_v16 = vld [vmem:[%s1581_s23 + $0x100] sm:$0xff]   ;;  %v1518_v21 = vld [vmem:[%s280_s6 + $0x38] sm:$0xff]   ;;  %v1519_v22 = vld [vmem:[%s280_s6 + $0x30] sm:$0xff]  }
  0x24   : > { %v1517_v18 = vld [vmem:[%s1581_s23 + $0x180] sm:$0xff]   ;;  %v1520_v23 = vld [vmem:[%s280_s6 + $0x28] sm:$0xff]  }
  0x25   : > { %1336 = vmatpush3.bf16.msra.mxu0 %v1475_v25  ;;  %v1521_v24 = vld [vmem:[%s280_s6 + $0x20] sm:$0xff]   ;;  %v1522_v25 = vld [vmem:[%s280_s6 + $0x18] sm:$0xff]  }
  0x26   : > { %1358 = vmatpush3.bf16.msra.mxu1 %v1476_v26  ;;  %1337 = vmatprep.subr.bf16.mxu0 %v1477_v27  ;;  %v1523_v26 = vld [vmem:[%s280_s6 + $0x10] sm:$0xff]   ;;  %v1524_v27 = vld [vmem:[%s280_s6 + $0x8] sm:$0xff]   ;;  %v1247_v38 = vld [vmem:[%s275_s9] ss:$0 sm:$0xff] }
  0x27   : > { %1359 = vmatprep.subr.bf16.mxu1 %v1478_v28  ;;  %v1525_v28 = vld [vmem:[%s280_s6] sm:$0xff]  }
  0x29   : > { %1338 = vmatpush3.bf16.msra.mxu0 %v1479_v31 }
  0x2a   : > { %1360 = vmatpush3.bf16.msra.mxu1 %v1480_v32  ;;  %1339 = vmatprep.subr.bf16.mxu0 %v1481_v33 }
  0x2b   : > { %1361 = vmatprep.subr.bf16.mxu1 %v1482_v34 }
  0x2d   : > { %1340 = vmatpush3.bf16.msra.mxu0 %v1483_v36 }
  0x2e   : > { %1362 = vmatpush3.bf16.msra.mxu1 %v1484_v37  ;;  %1369 = vmatprep.subr.bf16.mxu0 %v1486_v41 }
  0x2f   : > { %1391 = vmatprep.subr.bf16.mxu1 %v1487_v42 }
  0x30   : > { %900 = vmatmul.mubr.bf16.vlgmr.msra.gmra.mxu0 %v449_v44 }
  0x31   : > { %1370 = vmatpush3.bf16.msra.mxu0 %v1488_v47  ;;  %940 = vmatmul.mubr.bf16.vlgmr.msra.gmra.mxu1 %v471_v49 }
  0x32   : > { %1371 = vmatprep.subr.bf16.mxu0 %v1490_v50  ;;  %1392 = vmatpush3.bf16.msra.mxu1 %v1489_v52 }
  0x33   : > { %979 = vmatprep.mubr.bf16.mxu0 %v470_v53  ;;  %1393 = vmatprep.subr.bf16.mxu1 %v1491_v54 }
  0x34   : > { %1019 = vmatprep.mubr.bf16.mxu1 %v474_v56  ;;  %v1312_v56 = vld [vmem:[%s283_s12] ss:$0 sm:$0xff] }
  0x35   : > { %1372 = vmatpush3.bf16.msra.mxu0 %v1492_v55 }
  0x36   : > { %1373 = vmatprep.subr.bf16.mxu0 %v1494_v57  ;;  %1394 = vmatpush3.bf16.msra.mxu1 %v1493_v58 }
  0x37   : > { %1395 = vmatprep.subr.bf16.mxu1 %v1495_v59 }
  0x39   : > { %1374 = vmatpush3.bf16.msra.mxu0 %v1496_v60 }
  0x3a   : > { %1375 = vmatprep.subr.bf16.mxu0 %v1498_v61  ;;  %1396 = vmatpush3.bf16.msra.mxu1 %v1497_v62 }
  0x3b   : > { %1397 = vmatprep.subr.bf16.mxu1 %v1499_v63 }
  0x3d   : > { %1376 = vmatpush3.bf16.msra.mxu0 %v1500_v0 }
  0x3e   : > { %1377 = vmatprep.subr.bf16.mxu0 %v1502_v1  ;;  %1398 = vmatpush3.bf16.msra.mxu1 %v1501_v2 }
  0x3f   : > { %1399 = vmatprep.subr.bf16.mxu1 %v1503_v3 }
  0x41   : > { %1378 = vmatpush3.bf16.msra.mxu0 %v1504_v4 }
  0x42   : > { %1379 = vmatprep.subr.bf16.mxu0 %v1506_v5  ;;  %1400 = vmatpush3.bf16.msra.mxu1 %v1505_v6 }
  0x43   : > { %1401 = vmatprep.subr.bf16.mxu1 %v1507_v7 }
  0x45   : > { %1380 = vmatpush3.bf16.msra.mxu0 %v1508_v8 }
  0x46   : > { %1381 = vmatprep.subr.bf16.mxu0 %v1510_v9  ;;  %1402 = vmatpush3.bf16.msra.mxu1 %v1509_v10 }
  0x47   : > { %1403 = vmatprep.subr.bf16.mxu1 %v1511_v11 }
  0x49   : > { %1382 = vmatpush3.bf16.msra.mxu0 %v1512_v12 }
  0x4a   : > { %1383 = vmatprep.subr.bf16.mxu0 %v1514_v13  ;;  %1404 = vmatpush3.bf16.msra.mxu1 %v1513_v14 }
  0x4b   : > { %1405 = vmatprep.subr.bf16.mxu1 %v1515_v15 }
  0x4d   : > { %1384 = vmatpush3.bf16.msra.mxu0 %v1516_v16 }
  0x4e   : > { %1406 = vmatpush3.bf16.msra.mxu1 %v1517_v18  ;;  %1422 = vmatprep.subr.bf16.mxu0 %v1535_v20 }
  0x50   : > { %980 = vmatmul.mubr.bf16.vlgmr.msra.gmra.mxu0 %v456_v17 }
  0x51   : > { %1020 = vmatmul.mubr.bf16.vlgmr.msra.gmra.mxu1 %v472_v19  ;;  %1423 = vmatpush3.bf16.msra.mxu0 %v1518_v21 }
  0x52   : > { %1424 = vmatprep.subr.bf16.mxu0 %v1535_v20  ;;  %1438 = vmatprep.mubr.msk.bf16.mxu0 %vm1536_vm0, %v1535_v20 }
  0x55   : > { %1425 = vmatpush3.bf16.msra.mxu0 %v1519_v22 }
  0x56   : > { %1426 = vmatprep.subr.bf16.mxu0 %v1535_v20 }
  0x59   : > { %1427 = vmatpush3.bf16.msra.mxu0 %v1520_v23 }
  0x5a   : > { %1428 = vmatprep.subr.bf16.mxu0 %v1535_v20 }
  0x5d   : > { %1429 = vmatpush3.bf16.msra.mxu0 %v1521_v24 }
  0x5e   : > { %1430 = vmatprep.subr.bf16.mxu0 %v1535_v20 }
  0x61   : > { %1431 = vmatpush3.bf16.msra.mxu0 %v1522_v25 }
  0x62   : > { %1432 = vmatprep.subr.bf16.mxu0 %v1535_v20 }
  0x65   : > { %1433 = vmatpush3.bf16.msra.mxu0 %v1523_v26 }
  0x66   : > { %1434 = vmatprep.subr.bf16.mxu0 %v1535_v20 }
  0x69   : > { %1435 = vmatpush3.bf16.msra.mxu0 %v1524_v27 }
  0x6a   : > { %1436 = vmatprep.subr.bf16.mxu0 %v1535_v20 }
  0x6d   : > { %1437 = vmatpush3.bf16.msra.mxu0 %v1525_v28 }
  0xf0   : > { %v1341_v29 = vpop.f32.mrf.mxu0 }
  0xf1   : > { %v1363_v30 = vpop.f32.mrf.mxu1 }
  0xf2   : > { %v1342_v31 = vpop.f32.mrf.mxu0 }
  0xf3   : > { %v1364_v32 = vpop.f32.mrf.mxu1  ;;  %v1343_v37 = vadd.f32 %v1342_v31, %v1341_v29 }
  0xf4   : > { %v1344_v33 = vpop.f32.mrf.mxu0  ;;  %v1365_v40 = vadd.f32 %v1364_v32, %v1363_v30 }
  0xf5   : > { %v1366_v34 = vpop.f32.mrf.mxu1  ;;  %v902_v39 = vadd.f32 %v1343_v37, %v1247_v38 }
  0xf6   : > { %v1345_v35 = vpop.f32.mrf.mxu0 }
  0xf7   : > { %v1367_v36 = vpop.f32.mrf.mxu1  ;;  %v942_v44 = vadd.f32 %v1365_v40, %v902_v39 }
 0x110   : > { %v1385_v41 = vpop.f32.mrf.mxu0 }
 0x111   : > { %v1407_v42 = vpop.f32.mrf.mxu1 }
 0x112   : > { %v1386_v43 = vpop.f32.mrf.mxu0 }
 0x113   : > { %v1387_v45 = vadd.f32 %v1386_v43, %v1385_v41  ;;  %v1408_v46 = vpop.f32.mrf.mxu1 }
 0x114   : > { %v1388_v47 = vpop.f32.mrf.mxu0  ;;  %v1409_v49 = vadd.f32 %v1408_v46, %v1407_v42 }
 0x115   : > { %v982_v48 = vadd.f32 %v1387_v45, %v942_v44  ;;  %v1410_v50 = vpop.f32.mrf.mxu1 }
 0x116   : > { %v1389_v51 = vpop.f32.mrf.mxu0 }
 0x117   : > { %v1022_v52 = vadd.f32 %v1409_v49, %v982_v48  ;;  %v1411_v53 = vpop.f32.mrf.mxu1 }
 0x119   : > { %v1027_v54 = vmax.f32 %v1022_v52, 0.0 }
 0x11b   : > { %v1028_v55 = vpack.c.bf16 %v1027_v54, %v1027_v54 }
 0x11d   : > { %1439 = vmatmul.mubr.bf16.vlgmr.msra.gmra.mxu0 %v1028_v55 }
 0x1dd   : > { %v1134_v57 = vpop.f32.mrf.mxu0 }
 0x1de   : > { %v1135_v58 = vadd.f32 %v1312_v56, %v1134_v57 }
 0x1df   : > { %v1440_v59 = vpop.f32.mrf.mxu0 }
 0x1e0   : > { %1140 = vst [vmem:[%s287_s16] sm:$0x3] %v1135_v58 }
 0x1e1   : > { %v1137_v60 = vpop.f32.mrf.mxu0 }
 0x1e3   : > { %v1441_v61 = vpop.f32.mrf.mxu0 }
 0x1e4 PF: > { %s15_s18 = sadd.s32 1, %s1532_s18  }
 0x1e5   : > { %p12_p4 = scmp.ge.s32.totalorder %s15_s18, 4  }
 0x1e7   :  { %14 = sbr.rel (!%p12_p4) target bundleno = 1 (0x1), region = 82 }

</bundles_post_ra>
